<compile_context>
chip_gen: v7x
topology: tpu7x:2x2x1
jax: 0.10.0
libtpu: 0.0.40
codegen_flags: <defaults>
</compile_context>

<pallas_src>
import functools

import jax
import jax.numpy as jnp
from jax import lax
from jax.experimental import pallas as pl
from jax.experimental.pallas import tpu as pltpu

CONV_IN = 6
CONV_OUT = 12
CONV_K = 4
CONV_PAD = 2  # replicate ("edge") padding, matching padding_mode='replicate'


def _build_kernel(Bt, T, H, num_layers, n_seq):
    """Bt: batch tile, T: sequence length, H: hidden size."""

    def kernel(*refs):
        xp_ref, cw_ref, cb_ref = refs[0:3]
        lstm_refs = refs[3:3 + 3 * num_layers]
        (fc1w_ref, fc1b_ref, fc2w_ref, fc2b_ref) = refs[3 + 3 * num_layers:
                                                        7 + 3 * num_layers]
        out_ref = refs[7 + 3 * num_layers]
        gx_ref = refs[8 + 3 * num_layers]          # (T, Bt, 4H) scratch
        seq_refs = refs[9 + 3 * num_layers:]       # ping-pong (T, Bt, H)

        # ---- Conv1d via in-kernel im2col matmul + ReLU --------------------
        xp = xp_ref[...]                                           # (T+4, Bt, 6)
        cw = cw_ref[...]                                           # (24, 12) k-major
        cols = jnp.concatenate(
            [xp[k:k + T + 1] for k in range(CONV_K)], axis=-1)     # (T+1, Bt, 24)
        y = (jnp.einsum("tbk,ko->tbo", cols.astype(cw.dtype), cw,
                        preferred_element_type=jnp.float32)
             + cb_ref[...])                                        # (T+1, Bt, 12)
        y = jnp.maximum(y, 0.0)

        # ---- AvgPool1d(kernel=2, stride=1) along time ----------------------
        seq = 0.5 * (y[:T] + y[1:])                                # (T, Bt, 12)

        # ---- stacked LSTM (eval semantics) ---------------------------------
        # TODO(synk): inter-layer dropout (train-mode only) is not applied.
        h_last = jnp.zeros((Bt, H), jnp.float32)
        for l in range(num_layers):
            w_ih = lstm_refs[3 * l][...]          # (in_l, 4H)
            w_hh = lstm_refs[3 * l + 1][...]      # (H, 4H)
            bias = lstm_refs[3 * l + 2][...]      # (1, 4H)

            # Hoisted time-parallel input projection: one big matmul for the
            # whole sequence, stored in VMEM scratch.
            in_seq = seq if l == 0 else seq_refs[(l - 1) % n_seq][...]
            gx_ref[...] = (jnp.einsum("tbi,ih->tbh",
                                      in_seq.astype(w_ih.dtype), w_ih,
                                      preferred_element_type=jnp.float32)
                           + bias)                                 # (T, Bt, 4H)

            # Last layer's per-step outputs are never consumed -> skip store.
            write_ref = seq_refs[l % n_seq] if l < num_layers - 1 else None

            def step(t, carry, w_hh=w_hh, write_ref=write_ref):
                h, c = carry
                gates = (jnp.dot(h.astype(w_hh.dtype), w_hh,
                                 preferred_element_type=jnp.float32)
                         + gx_ref[t])                              # (Bt, 4H)
                # Full-width EUP pushes, then lane slices (i, f, g, o order).
                sig = jax.nn.sigmoid(gates)
                tah = jnp.tanh(gates)
                i_g = sig[:, 0:H]
                f_g = sig[:, H:2 * H]
                g_g = tah[:, 2 * H:3 * H]
                o_g = sig[:, 3 * H:4 * H]
                c = f_g * c + i_g * g_g
                h = o_g * jnp.tanh(c)
                if write_ref is not None:
                    write_ref[t] = h
                return h, c

            h0 = jnp.zeros((Bt, H), jnp.float32)
            c0 = jnp.zeros((Bt, H), jnp.float32)
            h_last, _ = lax.fori_loop(0, T, step, (h0, c0), unroll=True)

        # ---- FC head: Linear -> ReLU -> (N=1) Linear as lane reduction ----
        z = jnp.maximum(
            jnp.dot(h_last.astype(fc1w_ref.dtype), fc1w_ref[...],
                    preferred_element_type=jnp.float32) + fc1b_ref[...],
            0.0)                                                   # (Bt, H//2)
        out = jnp.sum(z * fc2w_ref[...], axis=-1, keepdims=True) + fc2b_ref[...]
        out_ref[...] = out                                         # (Bt, 1)

    return kernel


@functools.partial(jax.jit,
                   static_argnames=("hidden_unit", "num_layers", "mxu_dtype"))
def conv1d_lstm_forward(x, params, hidden_unit, num_layers,
                        mxu_dtype=jnp.float32):
    """x: (B, T, 6) float32 -> (B, 1) float32.

    mxu_dtype=jnp.bfloat16 casts the matmul (MXU) operands only, keeping f32
    accumulation and f32 h/c carries -- recommended on v6e/v7x.
    """
    B, T, Cin = x.shape
    assert Cin == CONV_IN
    H = hidden_unit

    # ---- batch padding / tiling --------------------------------------------
    B8 = max(8, ((B + 7) // 8) * 8)            # fill 8 sublanes, unmasked vst
    B_TILE = min(B8, 128)                      # per-program batch tile
    B_pad = ((B8 + B_TILE - 1) // B_TILE) * B_TILE
    n_blocks = B_pad // B_TILE

    xb = x.astype(jnp.float32)
    if B_pad != B:
        xb = jnp.pad(xb, ((0, B_pad - B), (0, 0), (0, 0)))
    # Replicate ("edge") padding of 2 each side on time (padding_mode='replicate').
    xp = jnp.pad(xb, ((0, 0), (CONV_PAD, CONV_PAD), (0, 0)), mode="edge")
    xp = jnp.transpose(xp, (1, 0, 2))                          # (T+4, B_pad, 6)

    # Conv weight flattened k-major (k, c) to match the in-kernel im2col order.
    conv_w = jnp.transpose(params["conv_w"], (2, 1, 0)).reshape(
        CONV_K * CONV_IN, CONV_OUT).astype(mxu_dtype)          # (24, 12)
    conv_b = params["conv_b"].reshape(1, CONV_OUT).astype(jnp.float32)

    lstm_args = []
    for l in range(num_layers):
        lstm_args += [
            params[f"w_ih{l}"].T.astype(mxu_dtype),            # (in_l, 4H)
            params[f"w_hh{l}"].T.astype(mxu_dtype),            # (H, 4H)
            (params[f"b_ih{l}"] + params[f"b_hh{l}"]).reshape(1, 4 * H)
            .astype(jnp.float32),
        ]

    fc1_w = params["fc1_w"].T.astype(mxu_dtype)                # (H, H//2)
    fc1_b = params["fc1_b"].reshape(1, H // 2).astype(jnp.float32)
    fc2_w = params["fc2_w"].reshape(1, H // 2).astype(jnp.float32)  # row vector
    fc2_b = params["fc2_b"].reshape(1, 1).astype(jnp.float32)

    args = [xp, conv_w, conv_b] + lstm_args + [fc1_w, fc1_b, fc2_w, fc2_b]

    n_seq = min(2, num_layers - 1) if num_layers > 1 else 0
    kernel = _build_kernel(B_TILE, T, H, num_layers, n_seq)

    in_specs = [pl.BlockSpec((T + 2 * CONV_PAD, B_TILE, CONV_IN),
                             lambda i: (0, i, 0))]
    for a in args[1:]:  # weights/biases: one full-array block, fetched once
        in_specs.append(pl.BlockSpec(a.shape, lambda i, nd=a.ndim: (0,) * nd))

    out_specs = pl.BlockSpec((B_TILE, 1), lambda i: (i, 0))

    scratch_shapes = [pltpu.VMEM((T, B_TILE, 4 * H), jnp.float32)]   # gx
    scratch_shapes += [pltpu.VMEM((T, B_TILE, H), jnp.float32)] * n_seq

    out = pl.pallas_call(
        kernel,
        out_shape=jax.ShapeDtypeStruct((B_pad, 1), jnp.float32),
        grid=(n_blocks,),
        in_specs=in_specs,
        out_specs=out_specs,
        scratch_shapes=scratch_shapes,
        compiler_params=pltpu.CompilerParams(
            dimension_semantics=("parallel",)),
    )(*args)
    return out[:B]


def init_params(key, hidden_unit, num_layers):
    H = hidden_unit
    keys = iter(jax.random.split(key, 32))

    def u(k, shape, fan):
        bound = 1.0 / jnp.sqrt(float(fan))
        return jax.random.uniform(k, shape, jnp.float32, -bound, bound)

    params = {
        "conv_w": u(next(keys), (CONV_OUT, CONV_IN, CONV_K), CONV_IN * CONV_K),
        "conv_b": u(next(keys), (CONV_OUT,), CONV_IN * CONV_K),
        "fc1_w": u(next(keys), (H // 2, H), H),
        "fc1_b": u(next(keys), (H // 2,), H),
        "fc2_w": u(next(keys), (1, H // 2), H // 2),
        "fc2_b": u(next(keys), (1,), H // 2),
    }
    for l in range(num_layers):
        in_l = CONV_OUT if l == 0 else H
        params[f"w_ih{l}"] = u(next(keys), (4 * H, in_l), H)
        params[f"w_hh{l}"] = u(next(keys), (4 * H, H), H)
        params[f"b_ih{l}"] = u(next(keys), (4 * H,), H)
        params[f"b_hh{l}"] = u(next(keys), (4 * H,), H)
    return params


if __name__ == "__main__":
    B, T = 2, 8
    hidden_unit, num_layers = 32, 2

    key = jax.random.PRNGKey(0)
    k_x, k_p = jax.random.split(key)
    x = jax.random.normal(k_x, (B, T, CONV_IN), jnp.float32)
    params = init_params(k_p, hidden_unit, num_layers)

    out = conv1d_lstm_forward(x, params, hidden_unit, num_layers)
    out = jax.block_until_ready(out)
    assert out.shape == (B, 1), out.shape
    print("KERNEL_OK")
</pallas_src>

<mosaic_0001>
module attributes {stable_mosaic.version = 11 : i64} {
  func.func @kernel(%arg0: i32, %arg1: memref<12x8x6xf32, #tpu.memory_space<vmem>>, %arg2: memref<24x12xf32, #tpu.memory_space<vmem>>, %arg3: memref<1x12xf32, #tpu.memory_space<vmem>>, %arg4: memref<12x128xf32, #tpu.memory_space<vmem>>, %arg5: memref<32x128xf32, #tpu.memory_space<vmem>>, %arg6: memref<1x128xf32, #tpu.memory_space<vmem>>, %arg7: memref<32x128xf32, #tpu.memory_space<vmem>>, %arg8: memref<32x128xf32, #tpu.memory_space<vmem>>, %arg9: memref<1x128xf32, #tpu.memory_space<vmem>>, %arg10: memref<32x16xf32, #tpu.memory_space<vmem>>, %arg11: memref<1x16xf32, #tpu.memory_space<vmem>>, %arg12: memref<1x16xf32, #tpu.memory_space<vmem>>, %arg13: memref<1x1xf32, #tpu.memory_space<vmem>>, %arg14: memref<8x1xf32, #tpu.memory_space<vmem>>, %arg15: memref<8x8x128xf32, #tpu.memory_space<vmem>>, %arg16: memref<8x8x32xf32, #tpu.memory_space<vmem>>) attributes {dimension_semantics = [#tpu.dimension_semantics<parallel>], iteration_bounds = array<i64: 1>, scalar_prefetch = 0 : i64, scratch_operands = 2 : i64, tpu.core_type = #tpu.core_type<tc>, window_params = [{transform_indices = @transform_0, window_bounds = array<i64: 12, 8, 6>}, {pipeline_mode = #tpu.pipeline_mode<synchronous>, transform_indices = @transform_1, window_bounds = array<i64: 24, 12>}, {pipeline_mode = #tpu.pipeline_mode<synchronous>, transform_indices = @transform_2, window_bounds = array<i64: 1, 12>}, {pipeline_mode = #tpu.pipeline_mode<synchronous>, transform_indices = @transform_3, window_bounds = array<i64: 12, 128>}, {pipeline_mode = #tpu.pipeline_mode<synchronous>, transform_indices = @transform_4, window_bounds = array<i64: 32, 128>}, {pipeline_mode = #tpu.pipeline_mode<synchronous>, transform_indices = @transform_5, window_bounds = array<i64: 1, 128>}, {pipeline_mode = #tpu.pipeline_mode<synchronous>, transform_indices = @transform_6, window_bounds = array<i64: 32, 128>}, {pipeline_mode = #tpu.pipeline_mode<synchronous>, transform_indices = @transform_7, window_bounds = array<i64: 32, 128>}, {pipeline_mode = #tpu.pipeline_mode<synchronous>, transform_indices = @transform_8, window_bounds = array<i64: 1, 128>}, {pipeline_mode = #tpu.pipeline_mode<synchronous>, transform_indices = @transform_9, window_bounds = array<i64: 32, 16>}, {pipeline_mode = #tpu.pipeline_mode<synchronous>, transform_indices = @transform_10, window_bounds = array<i64: 1, 16>}, {pipeline_mode = #tpu.pipeline_mode<synchronous>, transform_indices = @transform_11, window_bounds = array<i64: 1, 16>}, {pipeline_mode = #tpu.pipeline_mode<synchronous>, transform_indices = @transform_12, window_bounds = array<i64: 1, 1>}, {transform_indices = @transform_13, window_bounds = array<i64: 8, 1>}]} {
    %c0 = arith.constant 0 : index
    %c0_0 = arith.constant 0 : index
    %c0_1 = arith.constant 0 : index
    %0 = vector.load %arg1[%c0, %c0_0, %c0_1] : memref<12x8x6xf32, #tpu.memory_space<vmem>>, vector<12x8x6xf32>
    %c0_2 = arith.constant 0 : index
    %c0_3 = arith.constant 0 : index
    %1 = vector.load %arg2[%c0_2, %c0_3] : memref<24x12xf32, #tpu.memory_space<vmem>>, vector<24x12xf32>
    %2 = vector.extract_strided_slice %0 {offsets = [0, 0, 0], sizes = [9, 8, 6], strides = [1, 1, 1]} : vector<12x8x6xf32> to vector<9x8x6xf32>
    %3 = vector.extract_strided_slice %0 {offsets = [1, 0, 0], sizes = [9, 8, 6], strides = [1, 1, 1]} : vector<12x8x6xf32> to vector<9x8x6xf32>
    %4 = vector.extract_strided_slice %0 {offsets = [2, 0, 0], sizes = [9, 8, 6], strides = [1, 1, 1]} : vector<12x8x6xf32> to vector<9x8x6xf32>
    %5 = vector.extract_strided_slice %0 {offsets = [3, 0, 0], sizes = [9, 8, 6], strides = [1, 1, 1]} : vector<12x8x6xf32> to vector<9x8x6xf32>
    %6 = tpu.concatenate %2, %3, %4, %5 in 2 : vector<9x8x6xf32>, vector<9x8x6xf32>, vector<9x8x6xf32>, vector<9x8x6xf32> -> vector<9x8x24xf32>
    "tpu.trace_start"() <{level = 10 : i32, message = "tbk,ko->tbo"}> : () -> ()
    %cst = arith.constant dense<0.000000e+00> : vector<9x8x12xf32>
    %7 = tpu.matmul %6, %1, %cst {dimension_numbers = #tpu.dot_dimension_numbers<[2], [0], [0, 1], [1], [0, 0, 0, 1, 1, 1], [], []>} : vector<9x8x24xf32>, vector<24x12xf32>, vector<9x8x12xf32> -> vector<9x8x12xf32>
    "tpu.trace_stop"() : () -> ()
    %c0_4 = arith.constant 0 : index
    %c0_5 = arith.constant 0 : index
    %8 = vector.load %arg3[%c0_4, %c0_5] : memref<1x12xf32, #tpu.memory_space<vmem>>, vector<1x12xf32>
    %9 = vector.shape_cast %8 : vector<1x12xf32> to vector<1x1x12xf32>
    %10 = vector.broadcast %9 : vector<1x1x12xf32> to vector<9x8x12xf32>
    %11 = arith.addf %7, %10 : vector<9x8x12xf32>
    %cst_6 = arith.constant 0.000000e+00 : f32
    %12 = vector.broadcast %cst_6 : f32 to vector<9x8x12xf32>
    %13 = arith.maximumf %11, %12 : vector<9x8x12xf32>
    %14 = vector.extract_strided_slice %13 {offsets = [0, 0, 0], sizes = [8, 8, 12], strides = [1, 1, 1]} : vector<9x8x12xf32> to vector<8x8x12xf32>
    %15 = vector.extract_strided_slice %13 {offsets = [1, 0, 0], sizes = [8, 8, 12], strides = [1, 1, 1]} : vector<9x8x12xf32> to vector<8x8x12xf32>
    %16 = arith.addf %14, %15 : vector<8x8x12xf32>
    %cst_7 = arith.constant 5.000000e-01 : f32
    %17 = vector.broadcast %cst_7 : f32 to vector<8x8x12xf32>
    %18 = arith.mulf %17, %16 : vector<8x8x12xf32>
    %c0_8 = arith.constant 0 : index
    %c0_9 = arith.constant 0 : index
    %19 = vector.load %arg4[%c0_8, %c0_9] : memref<12x128xf32, #tpu.memory_space<vmem>>, vector<12x128xf32>
    %c0_10 = arith.constant 0 : index
    %c0_11 = arith.constant 0 : index
    %20 = vector.load %arg5[%c0_10, %c0_11] : memref<32x128xf32, #tpu.memory_space<vmem>>, vector<32x128xf32>
    %c0_12 = arith.constant 0 : index
    %c0_13 = arith.constant 0 : index
    %21 = vector.load %arg6[%c0_12, %c0_13] : memref<1x128xf32, #tpu.memory_space<vmem>>, vector<1x128xf32>
    "tpu.trace_start"() <{level = 10 : i32, message = "tbi,ih->tbh"}> : () -> ()
    %cst_14 = arith.constant dense<0.000000e+00> : vector<8x8x128xf32>
    %22 = tpu.matmul %18, %19, %cst_14 {dimension_numbers = #tpu.dot_dimension_numbers<[2], [0], [0, 1], [1], [0, 0, 0, 1, 1, 1], [], []>} : vector<8x8x12xf32>, vector<12x128xf32>, vector<8x8x128xf32> -> vector<8x8x128xf32>
    "tpu.trace_stop"() : () -> ()
    %23 = vector.shape_cast %21 : vector<1x128xf32> to vector<1x1x128xf32>
    %24 = vector.broadcast %23 : vector<1x1x128xf32> to vector<8x8x128xf32>
    %25 = arith.addf %22, %24 : vector<8x8x128xf32>
    %c0_15 = arith.constant 0 : index
    %c0_16 = arith.constant 0 : index
    %c0_17 = arith.constant 0 : index
    %26 = vector.load %arg15[%c0_15, %c0_16, %c0_17] : memref<8x8x128xf32, #tpu.memory_space<vmem>>, vector<8x8x128xf32>
    tpu.vector_store %arg15[%c0_15, %c0_16, %c0_17], %25 {strides = array<i32>} : memref<8x8x128xf32, #tpu.memory_space<vmem>>, vector<8x8x128xf32>,
    %cst_18 = arith.constant 0.000000e+00 : f32
    %27 = vector.broadcast %cst_18 : f32 to vector<8x32xf32>
    %cst_19 = arith.constant 0.000000e+00 : f32
    %28 = vector.broadcast %cst_19 : f32 to vector<8x32xf32>
    %c0_i32 = arith.constant 0 : i32
    %cst_20 = arith.constant dense<0.000000e+00> : vector<8x128xf32>
    %29 = tpu.matmul %27, %20, %cst_20 {dimension_numbers = #tpu.dot_dimension_numbers<[1], [0], [0], [1], [0, 0, 1, 1], [], []>} : vector<8x32xf32>, vector<32x128xf32>, vector<8x128xf32> -> vector<8x128xf32>
    %30 = arith.index_cast %c0_i32 : i32 to index
    %c0_21 = arith.constant 0 : index
    %c0_22 = arith.constant 0 : index
    %31 = vector.load %arg15[%30, %c0_21, %c0_22] : memref<8x8x128xf32, #tpu.memory_space<vmem>>, vector<1x8x128xf32>
    %32 = vector.shape_cast %31 : vector<1x8x128xf32> to vector<8x128xf32>
    %33 = arith.addf %29, %32 : vector<8x128xf32>
    %34 = arith.negf %33 : vector<8x128xf32>
    %35 = math.exp %34 : vector<8x128xf32>
    %cst_23 = arith.constant 1.000000e+00 : f32
    %36 = vector.broadcast %cst_23 : f32 to vector<8x128xf32>
    %37 = arith.addf %36, %35 : vector<8x128xf32>
    %38 = arith.divf %36, %37 : vector<8x128xf32>
    %39 = math.tanh %33 : vector<8x128xf32>
    %40 = vector.extract_strided_slice %38 {offsets = [0, 0], sizes = [8, 32], strides = [1, 1]} : vector<8x128xf32> to vector<8x32xf32>
    %41 = vector.extract_strided_slice %38 {offsets = [0, 32], sizes = [8, 32], strides = [1, 1]} : vector<8x128xf32> to vector<8x32xf32>
    %42 = vector.extract_strided_slice %39 {offsets = [0, 64], sizes = [8, 32], strides = [1, 1]} : vector<8x128xf32> to vector<8x32xf32>
    %43 = vector.extract_strided_slice %38 {offsets = [0, 96], sizes = [8, 32], strides = [1, 1]} : vector<8x128xf32> to vector<8x32xf32>
    %44 = arith.mulf %41, %28 : vector<8x32xf32>
    %45 = arith.mulf %40, %42 : vector<8x32xf32>
    %46 = arith.addf %44, %45 : vector<8x32xf32>
    %47 = math.tanh %46 : vector<8x32xf32>
    %48 = arith.mulf %43, %47 : vector<8x32xf32>
    %49 = arith.index_cast %c0_i32 : i32 to index
    %c0_24 = arith.constant 0 : index
    %c0_25 = arith.constant 0 : index
    %50 = vector.load %arg16[%49, %c0_24, %c0_25] : memref<8x8x32xf32, #tpu.memory_space<vmem>>, vector<1x8x32xf32>
    %51 = vector.shape_cast %50 : vector<1x8x32xf32> to vector<8x32xf32>
    %52 = vector.shape_cast %48 : vector<8x32xf32> to vector<1x8x32xf32>
    tpu.vector_store %arg16[%49, %c0_24, %c0_25], %52 {strides = array<i32>} : memref<8x8x32xf32, #tpu.memory_space<vmem>>, vector<1x8x32xf32>,
    %c1_i32 = arith.constant 1 : i32
    %cst_26 = arith.constant dense<0.000000e+00> : vector<8x128xf32>
    %53 = tpu.matmul %48, %20, %cst_26 {dimension_numbers = #tpu.dot_dimension_numbers<[1], [0], [0], [1], [0, 0, 1, 1], [], []>} : vector<8x32xf32>, vector<32x128xf32>, vector<8x128xf32> -> vector<8x128xf32>
    %54 = arith.index_cast %c1_i32 : i32 to index
    %c0_27 = arith.constant 0 : index
    %c0_28 = arith.constant 0 : index
    %55 = vector.load %arg15[%54, %c0_27, %c0_28] : memref<8x8x128xf32, #tpu.memory_space<vmem>>, vector<1x8x128xf32>
    %56 = vector.shape_cast %55 : vector<1x8x128xf32> to vector<8x128xf32>
    %57 = arith.addf %53, %56 : vector<8x128xf32>
    %58 = arith.negf %57 : vector<8x128xf32>
    %59 = math.exp %58 : vector<8x128xf32>
    %cst_29 = arith.constant 1.000000e+00 : f32
    %60 = vector.broadcast %cst_29 : f32 to vector<8x128xf32>
    %61 = arith.addf %60, %59 : vector<8x128xf32>
    %62 = arith.divf %60, %61 : vector<8x128xf32>
    %63 = math.tanh %57 : vector<8x128xf32>
    %64 = vector.extract_strided_slice %62 {offsets = [0, 0], sizes = [8, 32], strides = [1, 1]} : vector<8x128xf32> to vector<8x32xf32>
    %65 = vector.extract_strided_slice %62 {offsets = [0, 32], sizes = [8, 32], strides = [1, 1]} : vector<8x128xf32> to vector<8x32xf32>
    %66 = vector.extract_strided_slice %63 {offsets = [0, 64], sizes = [8, 32], strides = [1, 1]} : vector<8x128xf32> to vector<8x32xf32>
    %67 = vector.extract_strided_slice %62 {offsets = [0, 96], sizes = [8, 32], strides = [1, 1]} : vector<8x128xf32> to vector<8x32xf32>
    %68 = arith.mulf %65, %46 : vector<8x32xf32>
    %69 = arith.mulf %64, %66 : vector<8x32xf32>
    %70 = arith.addf %68, %69 : vector<8x32xf32>
    %71 = math.tanh %70 : vector<8x32xf32>
    %72 = arith.mulf %67, %71 : vector<8x32xf32>
    %73 = arith.index_cast %c1_i32 : i32 to index
    %c0_30 = arith.constant 0 : index
    %c0_31 = arith.constant 0 : index
    %74 = vector.load %arg16[%73, %c0_30, %c0_31] : memref<8x8x32xf32, #tpu.memory_space<vmem>>, vector<1x8x32xf32>
    %75 = vector.shape_cast %74 : vector<1x8x32xf32> to vector<8x32xf32>
    %76 = vector.shape_cast %72 : vector<8x32xf32> to vector<1x8x32xf32>
    tpu.vector_store %arg16[%73, %c0_30, %c0_31], %76 {strides = array<i32>} : memref<8x8x32xf32, #tpu.memory_space<vmem>>, vector<1x8x32xf32>,
    %c2_i32 = arith.constant 2 : i32
    %cst_32 = arith.constant dense<0.000000e+00> : vector<8x128xf32>
    %77 = tpu.matmul %72, %20, %cst_32 {dimension_numbers = #tpu.dot_dimension_numbers<[1], [0], [0], [1], [0, 0, 1, 1], [], []>} : vector<8x32xf32>, vector<32x128xf32>, vector<8x128xf32> -> vector<8x128xf32>
    %78 = arith.index_cast %c2_i32 : i32 to index
    %c0_33 = arith.constant 0 : index
    %c0_34 = arith.constant 0 : index
    %79 = vector.load %arg15[%78, %c0_33, %c0_34] : memref<8x8x128xf32, #tpu.memory_space<vmem>>, vector<1x8x128xf32>
    %80 = vector.shape_cast %79 : vector<1x8x128xf32> to vector<8x128xf32>
    %81 = arith.addf %77, %80 : vector<8x128xf32>
    %82 = arith.negf %81 : vector<8x128xf32>
    %83 = math.exp %82 : vector<8x128xf32>
    %cst_35 = arith.constant 1.000000e+00 : f32
    %84 = vector.broadcast %cst_35 : f32 to vector<8x128xf32>
    %85 = arith.addf %84, %83 : vector<8x128xf32>
    %86 = arith.divf %84, %85 : vector<8x128xf32>
    %87 = math.tanh %81 : vector<8x128xf32>
    %88 = vector.extract_strided_slice %86 {offsets = [0, 0], sizes = [8, 32], strides = [1, 1]} : vector<8x128xf32> to vector<8x32xf32>
    %89 = vector.extract_strided_slice %86 {offsets = [0, 32], sizes = [8, 32], strides = [1, 1]} : vector<8x128xf32> to vector<8x32xf32>
    %90 = vector.extract_strided_slice %87 {offsets = [0, 64], sizes = [8, 32], strides = [1, 1]} : vector<8x128xf32> to vector<8x32xf32>
    %91 = vector.extract_strided_slice %86 {offsets = [0, 96], sizes = [8, 32], strides = [1, 1]} : vector<8x128xf32> to vector<8x32xf32>
    %92 = arith.mulf %89, %70 : vector<8x32xf32>
    %93 = arith.mulf %88, %90 : vector<8x32xf32>
    %94 = arith.addf %92, %93 : vector<8x32xf32>
    %95 = math.tanh %94 : vector<8x32xf32>
    %96 = arith.mulf %91, %95 : vector<8x32xf32>
    %97 = arith.index_cast %c2_i32 : i32 to index
    %c0_36 = arith.constant 0 : index
    %c0_37 = arith.constant 0 : index
    %98 = vector.load %arg16[%97, %c0_36, %c0_37] : memref<8x8x32xf32, #tpu.memory_space<vmem>>, vector<1x8x32xf32>
    %99 = vector.shape_cast %98 : vector<1x8x32xf32> to vector<8x32xf32>
    %100 = vector.shape_cast %96 : vector<8x32xf32> to vector<1x8x32xf32>
    tpu.vector_store %arg16[%97, %c0_36, %c0_37], %100 {strides = array<i32>} : memref<8x8x32xf32, #tpu.memory_space<vmem>>, vector<1x8x32xf32>,
    %c3_i32 = arith.constant 3 : i32
    %cst_38 = arith.constant dense<0.000000e+00> : vector<8x128xf32>
    %101 = tpu.matmul %96, %20, %cst_38 {dimension_numbers = #tpu.dot_dimension_numbers<[1], [0], [0], [1], [0, 0, 1, 1], [], []>} : vector<8x32xf32>, vector<32x128xf32>, vector<8x128xf32> -> vector<8x128xf32>
    %102 = arith.index_cast %c3_i32 : i32 to index
    %c0_39 = arith.constant 0 : index
    %c0_40 = arith.constant 0 : index
    %103 = vector.load %arg15[%102, %c0_39, %c0_40] : memref<8x8x128xf32, #tpu.memory_space<vmem>>, vector<1x8x128xf32>
    %104 = vector.shape_cast %103 : vector<1x8x128xf32> to vector<8x128xf32>
    %105 = arith.addf %101, %104 : vector<8x128xf32>
    %106 = arith.negf %105 : vector<8x128xf32>
    %107 = math.exp %106 : vector<8x128xf32>
    %cst_41 = arith.constant 1.000000e+00 : f32
    %108 = vector.broadcast %cst_41 : f32 to vector<8x128xf32>
    %109 = arith.addf %108, %107 : vector<8x128xf32>
    %110 = arith.divf %108, %109 : vector<8x128xf32>
    %111 = math.tanh %105 : vector<8x128xf32>
    %112 = vector.extract_strided_slice %110 {offsets = [0, 0], sizes = [8, 32], strides = [1, 1]} : vector<8x128xf32> to vector<8x32xf32>
    %113 = vector.extract_strided_slice %110 {offsets = [0, 32], sizes = [8, 32], strides = [1, 1]} : vector<8x128xf32> to vector<8x32xf32>
    %114 = vector.extract_strided_slice %111 {offsets = [0, 64], sizes = [8, 32], strides = [1, 1]} : vector<8x128xf32> to vector<8x32xf32>
    %115 = vector.extract_strided_slice %110 {offsets = [0, 96], sizes = [8, 32], strides = [1, 1]} : vector<8x128xf32> to vector<8x32xf32>
    %116 = arith.mulf %113, %94 : vector<8x32xf32>
    %117 = arith.mulf %112, %114 : vector<8x32xf32>
    %118 = arith.addf %116, %117 : vector<8x32xf32>
    %119 = math.tanh %118 : vector<8x32xf32>
    %120 = arith.mulf %115, %119 : vector<8x32xf32>
    %121 = arith.index_cast %c3_i32 : i32 to index
    %c0_42 = arith.constant 0 : index
    %c0_43 = arith.constant 0 : index
    %122 = vector.load %arg16[%121, %c0_42, %c0_43] : memref<8x8x32xf32, #tpu.memory_space<vmem>>, vector<1x8x32xf32>
    %123 = vector.shape_cast %122 : vector<1x8x32xf32> to vector<8x32xf32>
    %124 = vector.shape_cast %120 : vector<8x32xf32> to vector<1x8x32xf32>
    tpu.vector_store %arg16[%121, %c0_42, %c0_43], %124 {strides = array<i32>} : memref<8x8x32xf32, #tpu.memory_space<vmem>>, vector<1x8x32xf32>,
    %c4_i32 = arith.constant 4 : i32
    %cst_44 = arith.constant dense<0.000000e+00> : vector<8x128xf32>
    %125 = tpu.matmul %120, %20, %cst_44 {dimension_numbers = #tpu.dot_dimension_numbers<[1], [0], [0], [1], [0, 0, 1, 1], [], []>} : vector<8x32xf32>, vector<32x128xf32>, vector<8x128xf32> -> vector<8x128xf32>
    %126 = arith.index_cast %c4_i32 : i32 to index
    %c0_45 = arith.constant 0 : index
    %c0_46 = arith.constant 0 : index
    %127 = vector.load %arg15[%126, %c0_45, %c0_46] : memref<8x8x128xf32, #tpu.memory_space<vmem>>, vector<1x8x128xf32>
    %128 = vector.shape_cast %127 : vector<1x8x128xf32> to vector<8x128xf32>
    %129 = arith.addf %125, %128 : vector<8x128xf32>
    %130 = arith.negf %129 : vector<8x128xf32>
    %131 = math.exp %130 : vector<8x128xf32>
    %cst_47 = arith.constant 1.000000e+00 : f32
    %132 = vector.broadcast %cst_47 : f32 to vector<8x128xf32>
    %133 = arith.addf %132, %131 : vector<8x128xf32>
    %134 = arith.divf %132, %133 : vector<8x128xf32>
    %135 = math.tanh %129 : vector<8x128xf32>
    %136 = vector.extract_strided_slice %134 {offsets = [0, 0], sizes = [8, 32], strides = [1, 1]} : vector<8x128xf32> to vector<8x32xf32>
    %137 = vector.extract_strided_slice %134 {offsets = [0, 32], sizes = [8, 32], strides = [1, 1]} : vector<8x128xf32> to vector<8x32xf32>
    %138 = vector.extract_strided_slice %135 {offsets = [0, 64], sizes = [8, 32], strides = [1, 1]} : vector<8x128xf32> to vector<8x32xf32>
    %139 = vector.extract_strided_slice %134 {offsets = [0, 96], sizes = [8, 32], strides = [1, 1]} : vector<8x128xf32> to vector<8x32xf32>
    %140 = arith.mulf %137, %118 : vector<8x32xf32>
    %141 = arith.mulf %136, %138 : vector<8x32xf32>
    %142 = arith.addf %140, %141 : vector<8x32xf32>
    %143 = math.tanh %142 : vector<8x32xf32>
    %144 = arith.mulf %139, %143 : vector<8x32xf32>
    %145 = arith.index_cast %c4_i32 : i32 to index
    %c0_48 = arith.constant 0 : index
    %c0_49 = arith.constant 0 : index
    %146 = vector.load %arg16[%145, %c0_48, %c0_49] : memref<8x8x32xf32, #tpu.memory_space<vmem>>, vector<1x8x32xf32>
    %147 = vector.shape_cast %146 : vector<1x8x32xf32> to vector<8x32xf32>
    %148 = vector.shape_cast %144 : vector<8x32xf32> to vector<1x8x32xf32>
    tpu.vector_store %arg16[%145, %c0_48, %c0_49], %148 {strides = array<i32>} : memref<8x8x32xf32, #tpu.memory_space<vmem>>, vector<1x8x32xf32>,
    %c5_i32 = arith.constant 5 : i32
    %cst_50 = arith.constant dense<0.000000e+00> : vector<8x128xf32>
    %149 = tpu.matmul %144, %20, %cst_50 {dimension_numbers = #tpu.dot_dimension_numbers<[1], [0], [0], [1], [0, 0, 1, 1], [], []>} : vector<8x32xf32>, vector<32x128xf32>, vector<8x128xf32> -> vector<8x128xf32>
    %150 = arith.index_cast %c5_i32 : i32 to index
    %c0_51 = arith.constant 0 : index
    %c0_52 = arith.constant 0 : index
    %151 = vector.load %arg15[%150, %c0_51, %c0_52] : memref<8x8x128xf32, #tpu.memory_space<vmem>>, vector<1x8x128xf32>
    %152 = vector.shape_cast %151 : vector<1x8x128xf32> to vector<8x128xf32>
    %153 = arith.addf %149, %152 : vector<8x128xf32>
    %154 = arith.negf %153 : vector<8x128xf32>
    %155 = math.exp %154 : vector<8x128xf32>
    %cst_53 = arith.constant 1.000000e+00 : f32
    %156 = vector.broadcast %cst_53 : f32 to vector<8x128xf32>
    %157 = arith.addf %156, %155 : vector<8x128xf32>
    %158 = arith.divf %156, %157 : vector<8x128xf32>
    %159 = math.tanh %153 : vector<8x128xf32>
    %160 = vector.extract_strided_slice %158 {offsets = [0, 0], sizes = [8, 32], strides = [1, 1]} : vector<8x128xf32> to vector<8x32xf32>
    %161 = vector.extract_strided_slice %158 {offsets = [0, 32], sizes = [8, 32], strides = [1, 1]} : vector<8x128xf32> to vector<8x32xf32>
    %162 = vector.extract_strided_slice %159 {offsets = [0, 64], sizes = [8, 32], strides = [1, 1]} : vector<8x128xf32> to vector<8x32xf32>
    %163 = vector.extract_strided_slice %158 {offsets = [0, 96], sizes = [8, 32], strides = [1, 1]} : vector<8x128xf32> to vector<8x32xf32>
    %164 = arith.mulf %161, %142 : vector<8x32xf32>
    %165 = arith.mulf %160, %162 : vector<8x32xf32>
    %166 = arith.addf %164, %165 : vector<8x32xf32>
    %167 = math.tanh %166 : vector<8x32xf32>
    %168 = arith.mulf %163, %167 : vector<8x32xf32>
    %169 = arith.index_cast %c5_i32 : i32 to index
    %c0_54 = arith.constant 0 : index
    %c0_55 = arith.constant 0 : index
    %170 = vector.load %arg16[%169, %c0_54, %c0_55] : memref<8x8x32xf32, #tpu.memory_space<vmem>>, vector<1x8x32xf32>
    %171 = vector.shape_cast %170 : vector<1x8x32xf32> to vector<8x32xf32>
    %172 = vector.shape_cast %168 : vector<8x32xf32> to vector<1x8x32xf32>
    tpu.vector_store %arg16[%169, %c0_54, %c0_55], %172 {strides = array<i32>} : memref<8x8x32xf32, #tpu.memory_space<vmem>>, vector<1x8x32xf32>,
    %c6_i32 = arith.constant 6 : i32
    %cst_56 = arith.constant dense<0.000000e+00> : vector<8x128xf32>
    %173 = tpu.matmul %168, %20, %cst_56 {dimension_numbers = #tpu.dot_dimension_numbers<[1], [0], [0], [1], [0, 0, 1, 1], [], []>} : vector<8x32xf32>, vector<32x128xf32>, vector<8x128xf32> -> vector<8x128xf32>
    %174 = arith.index_cast %c6_i32 : i32 to index
    %c0_57 = arith.constant 0 : index
    %c0_58 = arith.constant 0 : index
    %175 = vector.load %arg15[%174, %c0_57, %c0_58] : memref<8x8x128xf32, #tpu.memory_space<vmem>>, vector<1x8x128xf32>
    %176 = vector.shape_cast %175 : vector<1x8x128xf32> to vector<8x128xf32>
    %177 = arith.addf %173, %176 : vector<8x128xf32>
    %178 = arith.negf %177 : vector<8x128xf32>
    %179 = math.exp %178 : vector<8x128xf32>
    %cst_59 = arith.constant 1.000000e+00 : f32
    %180 = vector.broadcast %cst_59 : f32 to vector<8x128xf32>
    %181 = arith.addf %180, %179 : vector<8x128xf32>
    %182 = arith.divf %180, %181 : vector<8x128xf32>
    %183 = math.tanh %177 : vector<8x128xf32>
    %184 = vector.extract_strided_slice %182 {offsets = [0, 0], sizes = [8, 32], strides = [1, 1]} : vector<8x128xf32> to vector<8x32xf32>
    %185 = vector.extract_strided_slice %182 {offsets = [0, 32], sizes = [8, 32], strides = [1, 1]} : vector<8x128xf32> to vector<8x32xf32>
    %186 = vector.extract_strided_slice %183 {offsets = [0, 64], sizes = [8, 32], strides = [1, 1]} : vector<8x128xf32> to vector<8x32xf32>
    %187 = vector.extract_strided_slice %182 {offsets = [0, 96], sizes = [8, 32], strides = [1, 1]} : vector<8x128xf32> to vector<8x32xf32>
    %188 = arith.mulf %185, %166 : vector<8x32xf32>
    %189 = arith.mulf %184, %186 : vector<8x32xf32>
    %190 = arith.addf %188, %189 : vector<8x32xf32>
    %191 = math.tanh %190 : vector<8x32xf32>
    %192 = arith.mulf %187, %191 : vector<8x32xf32>
    %193 = arith.index_cast %c6_i32 : i32 to index
    %c0_60 = arith.constant 0 : index
    %c0_61 = arith.constant 0 : index
    %194 = vector.load %arg16[%193, %c0_60, %c0_61] : memref<8x8x32xf32, #tpu.memory_space<vmem>>, vector<1x8x32xf32>
    %195 = vector.shape_cast %194 : vector<1x8x32xf32> to vector<8x32xf32>
    %196 = vector.shape_cast %192 : vector<8x32xf32> to vector<1x8x32xf32>
    tpu.vector_store %arg16[%193, %c0_60, %c0_61], %196 {strides = array<i32>} : memref<8x8x32xf32, #tpu.memory_space<vmem>>, vector<1x8x32xf32>,
    %c7_i32 = arith.constant 7 : i32
    %cst_62 = arith.constant dense<0.000000e+00> : vector<8x128xf32>
    %197 = tpu.matmul %192, %20, %cst_62 {dimension_numbers = #tpu.dot_dimension_numbers<[1], [0], [0], [1], [0, 0, 1, 1], [], []>} : vector<8x32xf32>, vector<32x128xf32>, vector<8x128xf32> -> vector<8x128xf32>
    %198 = arith.index_cast %c7_i32 : i32 to index
    %c0_63 = arith.constant 0 : index
    %c0_64 = arith.constant 0 : index
    %199 = vector.load %arg15[%198, %c0_63, %c0_64] : memref<8x8x128xf32, #tpu.memory_space<vmem>>, vector<1x8x128xf32>
    %200 = vector.shape_cast %199 : vector<1x8x128xf32> to vector<8x128xf32>
    %201 = arith.addf %197, %200 : vector<8x128xf32>
    %202 = arith.negf %201 : vector<8x128xf32>
    %203 = math.exp %202 : vector<8x128xf32>
    %cst_65 = arith.constant 1.000000e+00 : f32
    %204 = vector.broadcast %cst_65 : f32 to vector<8x128xf32>
    %205 = arith.addf %204, %203 : vector<8x128xf32>
    %206 = arith.divf %204, %205 : vector<8x128xf32>
    %207 = math.tanh %201 : vector<8x128xf32>
    %208 = vector.extract_strided_slice %206 {offsets = [0, 0], sizes = [8, 32], strides = [1, 1]} : vector<8x128xf32> to vector<8x32xf32>
    %209 = vector.extract_strided_slice %206 {offsets = [0, 32], sizes = [8, 32], strides = [1, 1]} : vector<8x128xf32> to vector<8x32xf32>
    %210 = vector.extract_strided_slice %207 {offsets = [0, 64], sizes = [8, 32], strides = [1, 1]} : vector<8x128xf32> to vector<8x32xf32>
    %211 = vector.extract_strided_slice %206 {offsets = [0, 96], sizes = [8, 32], strides = [1, 1]} : vector<8x128xf32> to vector<8x32xf32>
    %212 = arith.mulf %209, %190 : vector<8x32xf32>
    %213 = arith.mulf %208, %210 : vector<8x32xf32>
    %214 = arith.addf %212, %213 : vector<8x32xf32>
    %215 = math.tanh %214 : vector<8x32xf32>
    %216 = arith.mulf %211, %215 : vector<8x32xf32>
    %217 = arith.index_cast %c7_i32 : i32 to index
    %c0_66 = arith.constant 0 : index
    %c0_67 = arith.constant 0 : index
    %218 = vector.load %arg16[%217, %c0_66, %c0_67] : memref<8x8x32xf32, #tpu.memory_space<vmem>>, vector<1x8x32xf32>
    %219 = vector.shape_cast %218 : vector<1x8x32xf32> to vector<8x32xf32>
    %220 = vector.shape_cast %216 : vector<8x32xf32> to vector<1x8x32xf32>
    tpu.vector_store %arg16[%217, %c0_66, %c0_67], %220 {strides = array<i32>} : memref<8x8x32xf32, #tpu.memory_space<vmem>>, vector<1x8x32xf32>,
    %c8_i32 = arith.constant 8 : i32
    %c0_68 = arith.constant 0 : index
    %c0_69 = arith.constant 0 : index
    %221 = vector.load %arg7[%c0_68, %c0_69] : memref<32x128xf32, #tpu.memory_space<vmem>>, vector<32x128xf32>
    %c0_70 = arith.constant 0 : index
    %c0_71 = arith.constant 0 : index
    %222 = vector.load %arg8[%c0_70, %c0_71] : memref<32x128xf32, #tpu.memory_space<vmem>>, vector<32x128xf32>
    %c0_72 = arith.constant 0 : index
    %c0_73 = arith.constant 0 : index
    %223 = vector.load %arg9[%c0_72, %c0_73] : memref<1x128xf32, #tpu.memory_space<vmem>>, vector<1x128xf32>
    %c0_74 = arith.constant 0 : index
    %c0_75 = arith.constant 0 : index
    %c0_76 = arith.constant 0 : index
    %224 = vector.load %arg16[%c0_74, %c0_75, %c0_76] : memref<8x8x32xf32, #tpu.memory_space<vmem>>, vector<8x8x32xf32>
    "tpu.trace_start"() <{level = 10 : i32, message = "tbi,ih->tbh"}> : () -> ()
    %cst_77 = arith.constant dense<0.000000e+00> : vector<8x8x128xf32>
    %225 = tpu.matmul %224, %221, %cst_77 {dimension_numbers = #tpu.dot_dimension_numbers<[2], [0], [0, 1], [1], [0, 0, 0, 1, 1, 1], [], []>} : vector<8x8x32xf32>, vector<32x128xf32>, vector<8x8x128xf32> -> vector<8x8x128xf32>
    "tpu.trace_stop"() : () -> ()
    %226 = vector.shape_cast %223 : vector<1x128xf32> to vector<1x1x128xf32>
    %227 = vector.broadcast %226 : vector<1x1x128xf32> to vector<8x8x128xf32>
    %228 = arith.addf %225, %227 : vector<8x8x128xf32>
    %c0_78 = arith.constant 0 : index
    %c0_79 = arith.constant 0 : index
    %c0_80 = arith.constant 0 : index
    %229 = vector.load %arg15[%c0_78, %c0_79, %c0_80] : memref<8x8x128xf32, #tpu.memory_space<vmem>>, vector<8x8x128xf32>
    tpu.vector_store %arg15[%c0_78, %c0_79, %c0_80], %228 {strides = array<i32>} : memref<8x8x128xf32, #tpu.memory_space<vmem>>, vector<8x8x128xf32>,
    %cst_81 = arith.constant 0.000000e+00 : f32
    %230 = vector.broadcast %cst_81 : f32 to vector<8x32xf32>
    %cst_82 = arith.constant 0.000000e+00 : f32
    %231 = vector.broadcast %cst_82 : f32 to vector<8x32xf32>
    %c0_i32_83 = arith.constant 0 : i32
    %cst_84 = arith.constant dense<0.000000e+00> : vector<8x128xf32>
    %232 = tpu.matmul %230, %222, %cst_84 {dimension_numbers = #tpu.dot_dimension_numbers<[1], [0], [0], [1], [0, 0, 1, 1], [], []>} : vector<8x32xf32>, vector<32x128xf32>, vector<8x128xf32> -> vector<8x128xf32>
    %233 = arith.index_cast %c0_i32_83 : i32 to index
    %c0_85 = arith.constant 0 : index
    %c0_86 = arith.constant 0 : index
    %234 = vector.load %arg15[%233, %c0_85, %c0_86] : memref<8x8x128xf32, #tpu.memory_space<vmem>>, vector<1x8x128xf32>
    %235 = vector.shape_cast %234 : vector<1x8x128xf32> to vector<8x128xf32>
    %236 = arith.addf %232, %235 : vector<8x128xf32>
    %237 = arith.negf %236 : vector<8x128xf32>
    %238 = math.exp %237 : vector<8x128xf32>
    %cst_87 = arith.constant 1.000000e+00 : f32
    %239 = vector.broadcast %cst_87 : f32 to vector<8x128xf32>
    %240 = arith.addf %239, %238 : vector<8x128xf32>
    %241 = arith.divf %239, %240 : vector<8x128xf32>
    %242 = math.tanh %236 : vector<8x128xf32>
    %243 = vector.extract_strided_slice %241 {offsets = [0, 0], sizes = [8, 32], strides = [1, 1]} : vector<8x128xf32> to vector<8x32xf32>
    %244 = vector.extract_strided_slice %241 {offsets = [0, 32], sizes = [8, 32], strides = [1, 1]} : vector<8x128xf32> to vector<8x32xf32>
    %245 = vector.extract_strided_slice %242 {offsets = [0, 64], sizes = [8, 32], strides = [1, 1]} : vector<8x128xf32> to vector<8x32xf32>
    %246 = vector.extract_strided_slice %241 {offsets = [0, 96], sizes = [8, 32], strides = [1, 1]} : vector<8x128xf32> to vector<8x32xf32>
    %247 = arith.mulf %244, %231 : vector<8x32xf32>
    %248 = arith.mulf %243, %245 : vector<8x32xf32>
    %249 = arith.addf %247, %248 : vector<8x32xf32>
    %250 = math.tanh %249 : vector<8x32xf32>
    %251 = arith.mulf %246, %250 : vector<8x32xf32>
    %c1_i32_88 = arith.constant 1 : i32
    %cst_89 = arith.constant dense<0.000000e+00> : vector<8x128xf32>
    %252 = tpu.matmul %251, %222, %cst_89 {dimension_numbers = #tpu.dot_dimension_numbers<[1], [0], [0], [1], [0, 0, 1, 1], [], []>} : vector<8x32xf32>, vector<32x128xf32>, vector<8x128xf32> -> vector<8x128xf32>
    %253 = arith.index_cast %c1_i32_88 : i32 to index
    %c0_90 = arith.constant 0 : index
    %c0_91 = arith.constant 0 : index
    %254 = vector.load %arg15[%253, %c0_90, %c0_91] : memref<8x8x128xf32, #tpu.memory_space<vmem>>, vector<1x8x128xf32>
    %255 = vector.shape_cast %254 : vector<1x8x128xf32> to vector<8x128xf32>
    %256 = arith.addf %252, %255 : vector<8x128xf32>
    %257 = arith.negf %256 : vector<8x128xf32>
    %258 = math.exp %257 : vector<8x128xf32>
    %cst_92 = arith.constant 1.000000e+00 : f32
    %259 = vector.broadcast %cst_92 : f32 to vector<8x128xf32>
    %260 = arith.addf %259, %258 : vector<8x128xf32>
    %261 = arith.divf %259, %260 : vector<8x128xf32>
    %262 = math.tanh %256 : vector<8x128xf32>
    %263 = vector.extract_strided_slice %261 {offsets = [0, 0], sizes = [8, 32], strides = [1, 1]} : vector<8x128xf32> to vector<8x32xf32>
    %264 = vector.extract_strided_slice %261 {offsets = [0, 32], sizes = [8, 32], strides = [1, 1]} : vector<8x128xf32> to vector<8x32xf32>
    %265 = vector.extract_strided_slice %262 {offsets = [0, 64], sizes = [8, 32], strides = [1, 1]} : vector<8x128xf32> to vector<8x32xf32>
    %266 = vector.extract_strided_slice %261 {offsets = [0, 96], sizes = [8, 32], strides = [1, 1]} : vector<8x128xf32> to vector<8x32xf32>
    %267 = arith.mulf %264, %249 : vector<8x32xf32>
    %268 = arith.mulf %263, %265 : vector<8x32xf32>
    %269 = arith.addf %267, %268 : vector<8x32xf32>
    %270 = math.tanh %269 : vector<8x32xf32>
    %271 = arith.mulf %266, %270 : vector<8x32xf32>
    %c2_i32_93 = arith.constant 2 : i32
    %cst_94 = arith.constant dense<0.000000e+00> : vector<8x128xf32>
    %272 = tpu.matmul %271, %222, %cst_94 {dimension_numbers = #tpu.dot_dimension_numbers<[1], [0], [0], [1], [0, 0, 1, 1], [], []>} : vector<8x32xf32>, vector<32x128xf32>, vector<8x128xf32> -> vector<8x128xf32>
    %273 = arith.index_cast %c2_i32_93 : i32 to index
    %c0_95 = arith.constant 0 : index
    %c0_96 = arith.constant 0 : index
    %274 = vector.load %arg15[%273, %c0_95, %c0_96] : memref<8x8x128xf32, #tpu.memory_space<vmem>>, vector<1x8x128xf32>
    %275 = vector.shape_cast %274 : vector<1x8x128xf32> to vector<8x128xf32>
    %276 = arith.addf %272, %275 : vector<8x128xf32>
    %277 = arith.negf %276 : vector<8x128xf32>
    %278 = math.exp %277 : vector<8x128xf32>
    %cst_97 = arith.constant 1.000000e+00 : f32
    %279 = vector.broadcast %cst_97 : f32 to vector<8x128xf32>
    %280 = arith.addf %279, %278 : vector<8x128xf32>
    %281 = arith.divf %279, %280 : vector<8x128xf32>
    %282 = math.tanh %276 : vector<8x128xf32>
    %283 = vector.extract_strided_slice %281 {offsets = [0, 0], sizes = [8, 32], strides = [1, 1]} : vector<8x128xf32> to vector<8x32xf32>
    %284 = vector.extract_strided_slice %281 {offsets = [0, 32], sizes = [8, 32], strides = [1, 1]} : vector<8x128xf32> to vector<8x32xf32>
    %285 = vector.extract_strided_slice %282 {offsets = [0, 64], sizes = [8, 32], strides = [1, 1]} : vector<8x128xf32> to vector<8x32xf32>
    %286 = vector.extract_strided_slice %281 {offsets = [0, 96], sizes = [8, 32], strides = [1, 1]} : vector<8x128xf32> to vector<8x32xf32>
    %287 = arith.mulf %284, %269 : vector<8x32xf32>
    %288 = arith.mulf %283, %285 : vector<8x32xf32>
    %289 = arith.addf %287, %288 : vector<8x32xf32>
    %290 = math.tanh %289 : vector<8x32xf32>
    %291 = arith.mulf %286, %290 : vector<8x32xf32>
    %c3_i32_98 = arith.constant 3 : i32
    %cst_99 = arith.constant dense<0.000000e+00> : vector<8x128xf32>
    %292 = tpu.matmul %291, %222, %cst_99 {dimension_numbers = #tpu.dot_dimension_numbers<[1], [0], [0], [1], [0, 0, 1, 1], [], []>} : vector<8x32xf32>, vector<32x128xf32>, vector<8x128xf32> -> vector<8x128xf32>
    %293 = arith.index_cast %c3_i32_98 : i32 to index
    %c0_100 = arith.constant 0 : index
    %c0_101 = arith.constant 0 : index
    %294 = vector.load %arg15[%293, %c0_100, %c0_101] : memref<8x8x128xf32, #tpu.memory_space<vmem>>, vector<1x8x128xf32>
    %295 = vector.shape_cast %294 : vector<1x8x128xf32> to vector<8x128xf32>
    %296 = arith.addf %292, %295 : vector<8x128xf32>
    %297 = arith.negf %296 : vector<8x128xf32>
    %298 = math.exp %297 : vector<8x128xf32>
    %cst_102 = arith.constant 1.000000e+00 : f32
    %299 = vector.broadcast %cst_102 : f32 to vector<8x128xf32>
    %300 = arith.addf %299, %298 : vector<8x128xf32>
    %301 = arith.divf %299, %300 : vector<8x128xf32>
    %302 = math.tanh %296 : vector<8x128xf32>
    %303 = vector.extract_strided_slice %301 {offsets = [0, 0], sizes = [8, 32], strides = [1, 1]} : vector<8x128xf32> to vector<8x32xf32>
    %304 = vector.extract_strided_slice %301 {offsets = [0, 32], sizes = [8, 32], strides = [1, 1]} : vector<8x128xf32> to vector<8x32xf32>
    %305 = vector.extract_strided_slice %302 {offsets = [0, 64], sizes = [8, 32], strides = [1, 1]} : vector<8x128xf32> to vector<8x32xf32>
    %306 = vector.extract_strided_slice %301 {offsets = [0, 96], sizes = [8, 32], strides = [1, 1]} : vector<8x128xf32> to vector<8x32xf32>
    %307 = arith.mulf %304, %289 : vector<8x32xf32>
    %308 = arith.mulf %303, %305 : vector<8x32xf32>
    %309 = arith.addf %307, %308 : vector<8x32xf32>
    %310 = math.tanh %309 : vector<8x32xf32>
    %311 = arith.mulf %306, %310 : vector<8x32xf32>
    %c4_i32_103 = arith.constant 4 : i32
    %cst_104 = arith.constant dense<0.000000e+00> : vector<8x128xf32>
    %312 = tpu.matmul %311, %222, %cst_104 {dimension_numbers = #tpu.dot_dimension_numbers<[1], [0], [0], [1], [0, 0, 1, 1], [], []>} : vector<8x32xf32>, vector<32x128xf32>, vector<8x128xf32> -> vector<8x128xf32>
    %313 = arith.index_cast %c4_i32_103 : i32 to index
    %c0_105 = arith.constant 0 : index
    %c0_106 = arith.constant 0 : index
    %314 = vector.load %arg15[%313, %c0_105, %c0_106] : memref<8x8x128xf32, #tpu.memory_space<vmem>>, vector<1x8x128xf32>
    %315 = vector.shape_cast %314 : vector<1x8x128xf32> to vector<8x128xf32>
    %316 = arith.addf %312, %315 : vector<8x128xf32>
    %317 = arith.negf %316 : vector<8x128xf32>
    %318 = math.exp %317 : vector<8x128xf32>
    %cst_107 = arith.constant 1.000000e+00 : f32
    %319 = vector.broadcast %cst_107 : f32 to vector<8x128xf32>
    %320 = arith.addf %319, %318 : vector<8x128xf32>
    %321 = arith.divf %319, %320 : vector<8x128xf32>
    %322 = math.tanh %316 : vector<8x128xf32>
    %323 = vector.extract_strided_slice %321 {offsets = [0, 0], sizes = [8, 32], strides = [1, 1]} : vector<8x128xf32> to vector<8x32xf32>
    %324 = vector.extract_strided_slice %321 {offsets = [0, 32], sizes = [8, 32], strides = [1, 1]} : vector<8x128xf32> to vector<8x32xf32>
    %325 = vector.extract_strided_slice %322 {offsets = [0, 64], sizes = [8, 32], strides = [1, 1]} : vector<8x128xf32> to vector<8x32xf32>
    %326 = vector.extract_strided_slice %321 {offsets = [0, 96], sizes = [8, 32], strides = [1, 1]} : vector<8x128xf32> to vector<8x32xf32>
    %327 = arith.mulf %324, %309 : vector<8x32xf32>
    %328 = arith.mulf %323, %325 : vector<8x32xf32>
    %329 = arith.addf %327, %328 : vector<8x32xf32>
    %330 = math.tanh %329 : vector<8x32xf32>
    %331 = arith.mulf %326, %330 : vector<8x32xf32>
    %c5_i32_108 = arith.constant 5 : i32
    %cst_109 = arith.constant dense<0.000000e+00> : vector<8x128xf32>
    %332 = tpu.matmul %331, %222, %cst_109 {dimension_numbers = #tpu.dot_dimension_numbers<[1], [0], [0], [1], [0, 0, 1, 1], [], []>} : vector<8x32xf32>, vector<32x128xf32>, vector<8x128xf32> -> vector<8x128xf32>
    %333 = arith.index_cast %c5_i32_108 : i32 to index
    %c0_110 = arith.constant 0 : index
    %c0_111 = arith.constant 0 : index
    %334 = vector.load %arg15[%333, %c0_110, %c0_111] : memref<8x8x128xf32, #tpu.memory_space<vmem>>, vector<1x8x128xf32>
    %335 = vector.shape_cast %334 : vector<1x8x128xf32> to vector<8x128xf32>
    %336 = arith.addf %332, %335 : vector<8x128xf32>
    %337 = arith.negf %336 : vector<8x128xf32>
    %338 = math.exp %337 : vector<8x128xf32>
    %cst_112 = arith.constant 1.000000e+00 : f32
    %339 = vector.broadcast %cst_112 : f32 to vector<8x128xf32>
    %340 = arith.addf %339, %338 : vector<8x128xf32>
    %341 = arith.divf %339, %340 : vector<8x128xf32>
    %342 = math.tanh %336 : vector<8x128xf32>
    %343 = vector.extract_strided_slice %341 {offsets = [0, 0], sizes = [8, 32], strides = [1, 1]} : vector<8x128xf32> to vector<8x32xf32>
    %344 = vector.extract_strided_slice %341 {offsets = [0, 32], sizes = [8, 32], strides = [1, 1]} : vector<8x128xf32> to vector<8x32xf32>
    %345 = vector.extract_strided_slice %342 {offsets = [0, 64], sizes = [8, 32], strides = [1, 1]} : vector<8x128xf32> to vector<8x32xf32>
    %346 = vector.extract_strided_slice %341 {offsets = [0, 96], sizes = [8, 32], strides = [1, 1]} : vector<8x128xf32> to vector<8x32xf32>
    %347 = arith.mulf %344, %329 : vector<8x32xf32>
    %348 = arith.mulf %343, %345 : vector<8x32xf32>
    %349 = arith.addf %347, %348 : vector<8x32xf32>
    %350 = math.tanh %349 : vector<8x32xf32>
    %351 = arith.mulf %346, %350 : vector<8x32xf32>
    %c6_i32_113 = arith.constant 6 : i32
    %cst_114 = arith.constant dense<0.000000e+00> : vector<8x128xf32>
    %352 = tpu.matmul %351, %222, %cst_114 {dimension_numbers = #tpu.dot_dimension_numbers<[1], [0], [0], [1], [0, 0, 1, 1], [], []>} : vector<8x32xf32>, vector<32x128xf32>, vector<8x128xf32> -> vector<8x128xf32>
    %353 = arith.index_cast %c6_i32_113 : i32 to index
    %c0_115 = arith.constant 0 : index
    %c0_116 = arith.constant 0 : index
    %354 = vector.load %arg15[%353, %c0_115, %c0_116] : memref<8x8x128xf32, #tpu.memory_space<vmem>>, vector<1x8x128xf32>
    %355 = vector.shape_cast %354 : vector<1x8x128xf32> to vector<8x128xf32>
    %356 = arith.addf %352, %355 : vector<8x128xf32>
    %357 = arith.negf %356 : vector<8x128xf32>
    %358 = math.exp %357 : vector<8x128xf32>
    %cst_117 = arith.constant 1.000000e+00 : f32
    %359 = vector.broadcast %cst_117 : f32 to vector<8x128xf32>
    %360 = arith.addf %359, %358 : vector<8x128xf32>
    %361 = arith.divf %359, %360 : vector<8x128xf32>
    %362 = math.tanh %356 : vector<8x128xf32>
    %363 = vector.extract_strided_slice %361 {offsets = [0, 0], sizes = [8, 32], strides = [1, 1]} : vector<8x128xf32> to vector<8x32xf32>
    %364 = vector.extract_strided_slice %361 {offsets = [0, 32], sizes = [8, 32], strides = [1, 1]} : vector<8x128xf32> to vector<8x32xf32>
    %365 = vector.extract_strided_slice %362 {offsets = [0, 64], sizes = [8, 32], strides = [1, 1]} : vector<8x128xf32> to vector<8x32xf32>
    %366 = vector.extract_strided_slice %361 {offsets = [0, 96], sizes = [8, 32], strides = [1, 1]} : vector<8x128xf32> to vector<8x32xf32>
    %367 = arith.mulf %364, %349 : vector<8x32xf32>
    %368 = arith.mulf %363, %365 : vector<8x32xf32>
    %369 = arith.addf %367, %368 : vector<8x32xf32>
    %370 = math.tanh %369 : vector<8x32xf32>
    %371 = arith.mulf %366, %370 : vector<8x32xf32>
    %c7_i32_118 = arith.constant 7 : i32
    %cst_119 = arith.constant dense<0.000000e+00> : vector<8x128xf32>
    %372 = tpu.matmul %371, %222, %cst_119 {dimension_numbers = #tpu.dot_dimension_numbers<[1], [0], [0], [1], [0, 0, 1, 1], [], []>} : vector<8x32xf32>, vector<32x128xf32>, vector<8x128xf32> -> vector<8x128xf32>
    %373 = arith.index_cast %c7_i32_118 : i32 to index
    %c0_120 = arith.constant 0 : index
    %c0_121 = arith.constant 0 : index
    %374 = vector.load %arg15[%373, %c0_120, %c0_121] : memref<8x8x128xf32, #tpu.memory_space<vmem>>, vector<1x8x128xf32>
    %375 = vector.shape_cast %374 : vector<1x8x128xf32> to vector<8x128xf32>
    %376 = arith.addf %372, %375 : vector<8x128xf32>
    %377 = arith.negf %376 : vector<8x128xf32>
    %378 = math.exp %377 : vector<8x128xf32>
    %cst_122 = arith.constant 1.000000e+00 : f32
    %379 = vector.broadcast %cst_122 : f32 to vector<8x128xf32>
    %380 = arith.addf %379, %378 : vector<8x128xf32>
    %381 = arith.divf %379, %380 : vector<8x128xf32>
    %382 = math.tanh %376 : vector<8x128xf32>
    %383 = vector.extract_strided_slice %381 {offsets = [0, 0], sizes = [8, 32], strides = [1, 1]} : vector<8x128xf32> to vector<8x32xf32>
    %384 = vector.extract_strided_slice %381 {offsets = [0, 32], sizes = [8, 32], strides = [1, 1]} : vector<8x128xf32> to vector<8x32xf32>
    %385 = vector.extract_strided_slice %382 {offsets = [0, 64], sizes = [8, 32], strides = [1, 1]} : vector<8x128xf32> to vector<8x32xf32>
    %386 = vector.extract_strided_slice %381 {offsets = [0, 96], sizes = [8, 32], strides = [1, 1]} : vector<8x128xf32> to vector<8x32xf32>
    %387 = arith.mulf %384, %369 : vector<8x32xf32>
    %388 = arith.mulf %383, %385 : vector<8x32xf32>
    %389 = arith.addf %387, %388 : vector<8x32xf32>
    %390 = math.tanh %389 : vector<8x32xf32>
    %391 = arith.mulf %386, %390 : vector<8x32xf32>
    %c8_i32_123 = arith.constant 8 : i32
    %c0_124 = arith.constant 0 : index
    %c0_125 = arith.constant 0 : index
    %392 = vector.load %arg10[%c0_124, %c0_125] : memref<32x16xf32, #tpu.memory_space<vmem>>, vector<32x16xf32>
    %cst_126 = arith.constant dense<0.000000e+00> : vector<8x16xf32>
    %393 = tpu.matmul %391, %392, %cst_126 {dimension_numbers = #tpu.dot_dimension_numbers<[1], [0], [0], [1], [0, 0, 1, 1], [], []>} : vector<8x32xf32>, vector<32x16xf32>, vector<8x16xf32> -> vector<8x16xf32>
    %c0_127 = arith.constant 0 : index
    %c0_128 = arith.constant 0 : index
    %394 = vector.load %arg11[%c0_127, %c0_128] : memref<1x16xf32, #tpu.memory_space<vmem>>, vector<1x16xf32>
    %395 = vector.broadcast %394 : vector<1x16xf32> to vector<8x16xf32>
    %396 = arith.addf %393, %395 : vector<8x16xf32>
    %cst_129 = arith.constant 0.000000e+00 : f32
    %397 = vector.broadcast %cst_129 : f32 to vector<8x16xf32>
    %398 = arith.maximumf %396, %397 : vector<8x16xf32>
    %c0_130 = arith.constant 0 : index
    %c0_131 = arith.constant 0 : index
    %399 = vector.load %arg12[%c0_130, %c0_131] : memref<1x16xf32, #tpu.memory_space<vmem>>, vector<1x16xf32>
    %400 = vector.broadcast %399 : vector<1x16xf32> to vector<8x16xf32>
    %401 = arith.mulf %398, %400 : vector<8x16xf32>
    %cst_132 = arith.constant dense<0.000000e+00> : vector<8xf32>
    %402 = vector.multi_reduction <add>, %401, %cst_132 [1] : vector<8x16xf32> to vector<8xf32>
    %403 = vector.shape_cast %402 : vector<8xf32> to vector<8x1xf32>
    %c0_133 = arith.constant 0 : index
    %c0_134 = arith.constant 0 : index
    %404 = vector.load %arg13[%c0_133, %c0_134] : memref<1x1xf32, #tpu.memory_space<vmem>>, vector<1x1xf32>
    %405 = vector.broadcast %404 : vector<1x1xf32> to vector<8x1xf32>
    %406 = arith.addf %403, %405 : vector<8x1xf32>
    %c0_135 = arith.constant 0 : index
    %c0_136 = arith.constant 0 : index
    %407 = vector.load %arg14[%c0_135, %c0_136] : memref<8x1xf32, #tpu.memory_space<vmem>>, vector<8x1xf32>
    tpu.vector_store %arg14[%c0_135, %c0_136], %406 {strides = array<i32>} : memref<8x1xf32, #tpu.memory_space<vmem>>, vector<8x1xf32>,
    return
  }
  func.func @transform_0(%arg0: i32) -> (i32, i32, i32) {
    %c0_i32 = arith.constant 0 : i32
    %c0_i32_0 = arith.constant 0 : i32
    %c0_i32_1 = arith.constant 0 : i32
    return %c0_i32, %arg0, %c0_i32_0 : i32, i32, i32
  }
  func.func @transform_1(%arg0: i32) -> (i32, i32) {
    %c0_i32 = arith.constant 0 : i32
    %c0_i32_0 = arith.constant 0 : i32
    %c0_i32_1 = arith.constant 0 : i32
    return %c0_i32, %c0_i32_0 : i32, i32
  }
  func.func @transform_2(%arg0: i32) -> (i32, i32) {
    %c0_i32 = arith.constant 0 : i32
    %c0_i32_0 = arith.constant 0 : i32
    %c0_i32_1 = arith.constant 0 : i32
    return %c0_i32, %c0_i32_0 : i32, i32
  }
  func.func @transform_3(%arg0: i32) -> (i32, i32) {
    %c0_i32 = arith.constant 0 : i32
    %c0_i32_0 = arith.constant 0 : i32
    %c0_i32_1 = arith.constant 0 : i32
    return %c0_i32, %c0_i32_0 : i32, i32
  }
  func.func @transform_4(%arg0: i32) -> (i32, i32) {
    %c0_i32 = arith.constant 0 : i32
    %c0_i32_0 = arith.constant 0 : i32
    %c0_i32_1 = arith.constant 0 : i32
    return %c0_i32, %c0_i32_0 : i32, i32
  }
  func.func @transform_5(%arg0: i32) -> (i32, i32) {
    %c0_i32 = arith.constant 0 : i32
    %c0_i32_0 = arith.constant 0 : i32
    %c0_i32_1 = arith.constant 0 : i32
    return %c0_i32, %c0_i32_0 : i32, i32
  }
  func.func @transform_6(%arg0: i32) -> (i32, i32) {
    %c0_i32 = arith.constant 0 : i32
    %c0_i32_0 = arith.constant 0 : i32
    %c0_i32_1 = arith.constant 0 : i32
    return %c0_i32, %c0_i32_0 : i32, i32
  }
  func.func @transform_7(%arg0: i32) -> (i32, i32) {
    %c0_i32 = arith.constant 0 : i32
    %c0_i32_0 = arith.constant 0 : i32
    %c0_i32_1 = arith.constant 0 : i32
    return %c0_i32, %c0_i32_0 : i32, i32
  }
  func.func @transform_8(%arg0: i32) -> (i32, i32) {
    %c0_i32 = arith.constant 0 : i32
    %c0_i32_0 = arith.constant 0 : i32
    %c0_i32_1 = arith.constant 0 : i32
    return %c0_i32, %c0_i32_0 : i32, i32
  }
  func.func @transform_9(%arg0: i32) -> (i32, i32) {
    %c0_i32 = arith.constant 0 : i32
    %c0_i32_0 = arith.constant 0 : i32
    %c0_i32_1 = arith.constant 0 : i32
    return %c0_i32, %c0_i32_0 : i32, i32
  }
  func.func @transform_10(%arg0: i32) -> (i32, i32) {
    %c0_i32 = arith.constant 0 : i32
    %c0_i32_0 = arith.constant 0 : i32
    %c0_i32_1 = arith.constant 0 : i32
    return %c0_i32, %c0_i32_0 : i32, i32
  }
  func.func @transform_11(%arg0: i32) -> (i32, i32) {
    %c0_i32 = arith.constant 0 : i32
    %c0_i32_0 = arith.constant 0 : i32
    %c0_i32_1 = arith.constant 0 : i32
    return %c0_i32, %c0_i32_0 : i32, i32
  }
  func.func @transform_12(%arg0: i32) -> (i32, i32) {
    %c0_i32 = arith.constant 0 : i32
    %c0_i32_0 = arith.constant 0 : i32
    %c0_i32_1 = arith.constant 0 : i32
    return %c0_i32, %c0_i32_0 : i32, i32
  }
  func.func @transform_13(%arg0: i32) -> (i32, i32) {
    %c0_i32 = arith.constant 0 : i32
    %c0_i32_0 = arith.constant 0 : i32
    return %arg0, %c0_i32 : i32, i32
  }
}

</mosaic_0001>

<bundles_post_ra>
// kernel: conv1d_lstm_forward.1
= control target key start
LH: loop header
LB: loop body
LE: loop exit
PB: predicated region body
PF: predicated region fallthrough
CT: control target
= control target key end

     0   :  { %v3101_v2 = vmov 0.0|0.0   ;;  %s3102_s29 = smov 6   ;;  %s3103_s30 = smov 18   ;;  %vm3104_vm0 = vmmov 0   ;;  %v3105_v4 = vmov 0.0   ;;  %vm153_vm1 = vcmask 48128   ;;  %s3694_s0 = inlined_call_operand.vmem [shape: f32[12,8,6], index: 0, kind: input, shape index: {}]   ;;  %s3695_s1 = inlined_call_operand.vmem [shape: f32[24,12], index: 1, kind: input, shape index: {}]   ;;  %s3696_s3 = inlined_call_operand.vmem [shape: f32[12,128], index: 3, kind: input, shape index: {}]   ;;  %s3697_s4 = inlined_call_operand.vmem [shape: f32[32,128], index: 4, kind: input, shape index: {}]   ;;  %s3698_s2 = inlined_call_operand.vmem [shape: f32[1,12], index: 2, kind: input, shape index: {}]   ;;  %s3699_s5 = inlined_call_operand.vmem [shape: f32[1,128], index: 5, kind: input, shape index: {}]   ;;  %s3700_s6 = inlined_call_operand.vmem [shape: f32[32,128], index: 6, kind: input, shape index: {}]   ;;  %s3701_s7 = inlined_call_operand.vmem [shape: f32[32,128], index: 7, kind: input, shape index: {}]   ;;  %s3702_s8 = inlined_call_operand.vmem [shape: f32[1,128], index: 8, kind: input, shape index: {}]   ;;  %s3703_s9 = inlined_call_operand.vmem [shape: f32[32,16], index: 9, kind: input, shape index: {}]   ;;  %s3704_s12 = inlined_call_operand.<no memory space> [shape: f32[1,1], index: 12, kind: input, shape index: {}]   ;;  %s3705_s10 = inlined_call_operand.vmem [shape: f32[1,16], index: 10, kind: input, shape index: {}]   ;;  %s3706_s11 = inlined_call_operand.vmem [shape: f32[1,16], index: 11, kind: input, shape index: {}]   ;;  %s3707_s13 = inlined_call_operand.vmem [shape: f32[8,1], index: 13, kind: output, shape index: {}]  }
   0x1   :  { %v3183_v0 = vld [vmem:[%s3694_s0 + $0x8] sm:$0xff]  ;;  %v3188_v1 = vld [vmem:[%s3694_s0 + $0x18] sm:$0xff]  ;;  %2845 = vmatprep.subr.bf16.mxu0 %v3101_v2  ;;  %v3198_v3 = vld [vmem:[%s3694_s0 + $0x10] sm:$0xff]  ;;  %2595 = vmatprep.mubr.msk.f32.mxu0 %vm3104_vm0, %v3105_v4  ;;  %s3106_s20 = smov 12   ;;  %vm163_vm2 = vcmask 97280   ;;  %vm173_vm3 = vcmask 146432  }
   0x2   :  { %70 = vrot.lane.b32.xlu0 %v3183_v0, %s3102_s29  ;;  %126 = vrot.lane.b32.xlu1 %v3188_v1, %s3103_s30  ;;  %v58_v5 = vld [vmem:[%s3695_s1] sm:$0xff]  ;;  %v59_v6 = vld [vmem:[%s3695_s1 + $0x8] sm:$0xff]  ;;  %vm190_vm4 = vcmask 195584   ;;  %vm390_vm5 = vcmask 1043456   ;;  %vm3107_vm6 = vmmov 1   ;;  %s3109_s19 = smov 32  }
   0x3   :  { %v2846_v7 = vpack.c.bf16 %v59_v6, %v58_v5  ;;  %v3215_v8 = vld [vmem:[%s3694_s0 + $0x20] sm:$0xff]  ;;  %v60_v9 = vld [vmem:[%s3695_s1 + $0x10] sm:$0xff]  ;;  %v3233_v10 = vld [vmem:[%s3694_s0 + $0x28] sm:$0xff]  ;;  %vm508_vm8 = vcmask 261120   ;;  %vm2389_vm9 = vcmask 130048   ;;  %vm2401_vm10 = vcmask 7168  }
   0x4   :  { %v3242_v11 = vld [vmem:[%s3694_s0 + $0x30] sm:$0xff]  ;;  %v3255_v12 = vld [vmem:[%s3694_s0 + $0x38] sm:$0xff]  ;;  %v3264_v13 = vld [vmem:[%s3694_s0 + $0x40] sm:$0xff] }
   0x5   :  { %2847 = vmatpush3.bf16.msra.mxu0 %v2846_v7  ;;  %v55_v14 = vld [vmem:[%s3694_s0 + $0x48] sm:$0xff]  ;;  %v56_v15 = vld [vmem:[%s3694_s0 + $0x50] sm:$0xff]  ;;  %v57_v16 = vld [vmem:[%s3694_s0 + $0x58] sm:$0xff] }
   0x6   :  { %98 = vrot.lane.b32.xlu0 %v3198_v3, %s3106_s20  ;;  %72 = vrot.lane.b32.xlu1 %v3198_v3, %s3102_s29  ;;  %v46_v19 = vld [vmem:[%s3694_s0] sm:$0xff]  ;;  %vm2849_vm7 = vmpackc.low %vm390_vm5, %vm3107_vm6 }
   0x7   :  { %2593 = vmatprep.subr.mxu0 %v3105_v4 }
   0x9   :  { %2594 = vmatpush3.msra.mxu0 %v60_v9 }
   0xa   :  { %100 = vrot.lane.b32.xlu0 %v3188_v1, %s3106_s20  ;;  %128 = vrot.lane.b32.xlu1 %v3215_v8, %s3103_s30 }
   0xb   :  { %2872 = vmatprep.subr.bf16.mxu0 %v3101_v2 }
   0xe   :  { %74 = vrot.lane.b32.xlu0 %v3188_v1, %s3102_s29  ;;  %102 = vrot.lane.b32.xlu1 %v3215_v8, %s3106_s20 }
  0x12   :  { %130 = vrot.lane.b32.xlu0 %v3233_v10, %s3103_s30  ;;  %76 = vrot.lane.b32.xlu1 %v3215_v8, %s3102_s29 }
  0x16   :  { %104 = vrot.lane.b32.xlu0 %v3233_v10, %s3106_s20  ;;  %132 = vrot.lane.b32.xlu1 %v3242_v11, %s3103_s30 }
  0x1a   :  { %78 = vrot.lane.b32.xlu0 %v3233_v10, %s3102_s29  ;;  %106 = vrot.lane.b32.xlu1 %v3242_v11, %s3106_s20 }
  0x1e   :  { %134 = vrot.lane.b32.xlu0 %v3255_v12, %s3103_s30  ;;  %80 = vrot.lane.b32.xlu1 %v3242_v11, %s3102_s29 }
  0x22   :  { %108 = vrot.lane.b32.xlu0 %v3255_v12, %s3106_s20  ;;  %136 = vrot.lane.b32.xlu1 %v3264_v13, %s3103_s30 }
  0x26   :  { %82 = vrot.lane.b32.xlu0 %v3255_v12, %s3102_s29  ;;  %110 = vrot.lane.b32.xlu1 %v3264_v13, %s3106_s20 }
  0x2a   :  { %138 = vrot.lane.b32.xlu0 %v55_v14, %s3103_s30  ;;  %84 = vrot.lane.b32.xlu1 %v3264_v13, %s3102_s29 }
  0x2e   :  { %112 = vrot.lane.b32.xlu0 %v55_v14, %s3106_s20  ;;  %140 = vrot.lane.b32.xlu1 %v56_v15, %s3103_s30 }
  0x32   :  { %86 = vrot.lane.b32.xlu0 %v55_v14, %s3102_s29  ;;  %114 = vrot.lane.b32.xlu1 %v56_v15, %s3106_s20  ;;  %v356_v14 = vld [vmem:[%s3697_s4 + $0x8] sm:$0xff] }
  0x36   :  { %142 = vrot.lane.b32.xlu0 %v57_v16, %s3103_s30  ;;  %v357_v16 = vld [vmem:[%s3697_s4 + $0x10] sm:$0xff] }
  0x74   :  { %v71_v17 = vpop.permute.xlu0 %70  ;;  %v127_v18 = vpop.permute.xlu1 %126 }
  0x75   :  { %v154_v20 = vsel %vm153_vm1, %v46_v19, %v71_v17  ;;  %v358_v17 = vld [vmem:[%s3697_s4 + $0x18] sm:$0xff]  ;;  %v2407_v19 = vld [vmem:[%s3698_s2] ss:$0 sm:$0xff] }
  0x78   :  { %v99_v21 = vpop.permute.xlu0 %98  ;;  %v73_v22 = vpop.permute.xlu1 %72 }
  0x79   :  { %v164_v23 = vsel %vm163_vm2, %v154_v20, %v99_v21  ;;  %v155_v24 = vsel %vm153_vm1, %v3183_v0, %v73_v22 }
  0x7a   :  { %v174_v25 = vsel %vm173_vm3, %v164_v23, %v127_v18  ;;  %v3379_v18 = vpack.c.bf16 %v358_v17, %v357_v16 }
  0x7b   :  { %2596 = vmatmul.mubr.msk.f32.vlgmr.msra.gmra.mrb[0].mxu0 %vm190_vm4, %v174_v25 }
  0x7c   :  { %v101_v26 = vpop.permute.xlu0 %100  ;;  %v129_v27 = vpop.permute.xlu1 %128  ;;  %2598 = vmatprep.mubr.msk.f32.mxu0 %vm3104_vm0, %v3105_v4 }
  0x7d   :  { %v165_v28 = vsel %vm163_vm2, %v155_v24, %v101_v26 }
  0x7e   :  { %v175_v29 = vsel %vm173_vm3, %v165_v28, %v129_v27 }
  0x7f   :  { %2599 = vmatmul.mubr.msk.f32.gmra.mrb[2].mxu0 %vm190_vm4, %v175_v29 }
  0x80   :  { %v75_v30 = vpop.permute.xlu0 %74  ;;  %v103_v31 = vpop.permute.xlu1 %102  ;;  %2601 = vmatprep.mubr.msk.f32.mxu0 %vm3104_vm0, %v3105_v4 }
  0x81   :  { %v156_v32 = vsel %vm153_vm1, %v3198_v3, %v75_v30 }
  0x82   :  { %v166_v33 = vsel %vm163_vm2, %v156_v32, %v103_v31 }
  0x84   :  { %v131_v34 = vpop.permute.xlu0 %130  ;;  %v77_v35 = vpop.permute.xlu1 %76 }
  0x85   :  { %v176_v36 = vsel %vm173_vm3, %v166_v33, %v131_v34  ;;  %v157_v37 = vsel %vm153_vm1, %v3188_v1, %v77_v35 }
  0x86   :  { %2602 = vmatmul.mubr.msk.f32.gmra.mrb[4].mxu0 %vm190_vm4, %v176_v36 }
  0x87   :  { %2604 = vmatprep.mubr.msk.f32.mxu0 %vm3104_vm0, %v3105_v4 }
  0x88   :  { %v105_v38 = vpop.permute.xlu0 %104  ;;  %v133_v39 = vpop.permute.xlu1 %132 }
  0x89   :  { %v167_v40 = vsel %vm163_vm2, %v157_v37, %v105_v38 }
  0x8a   :  { %v177_v41 = vsel %vm173_vm3, %v167_v40, %v133_v39 }
  0x8b   :  { %2605 = vmatmul.mubr.msk.f32.gmra.mrb[6].mxu0 %vm190_vm4, %v177_v41 }
  0x8c   :  { %v79_v42 = vpop.permute.xlu0 %78  ;;  %v107_v43 = vpop.permute.xlu1 %106  ;;  %2607 = vmatprep.mubr.msk.f32.mxu0 %vm3104_vm0, %v3105_v4 }
  0x8d   :  { %v158_v44 = vsel %vm153_vm1, %v3215_v8, %v79_v42 }
  0x8e   :  { %v168_v45 = vsel %vm163_vm2, %v158_v44, %v107_v43 }
  0x90   :  { %v135_v46 = vpop.permute.xlu0 %134  ;;  %v81_v47 = vpop.permute.xlu1 %80 }
  0x91   :  { %v178_v48 = vsel %vm173_vm3, %v168_v45, %v135_v46  ;;  %v159_v49 = vsel %vm153_vm1, %v3233_v10, %v81_v47  ;;  %v353_v10 = vld [vmem:[%s3696_s3] sm:$0xff] }
  0x92   :  { %2608 = vmatmul.mubr.msk.f32.gmra.mrb[8].mxu0 %vm190_vm4, %v178_v48 }
  0x93   :  { %2610 = vmatprep.mubr.msk.f32.mxu0 %vm3104_vm0, %v3105_v4 }
  0x94   :  { %v109_v50 = vpop.permute.xlu0 %108  ;;  %v137_v51 = vpop.permute.xlu1 %136 }
  0x95   :  { %v169_v52 = vsel %vm163_vm2, %v159_v49, %v109_v50 }
  0x96   :  { %v179_v53 = vsel %vm173_vm3, %v169_v52, %v137_v51 }
  0x97   :  { %2611 = vmatmul.mubr.msk.f32.gmra.mrb[10].mxu0 %vm190_vm4, %v179_v53 }
  0x98   :  { %v83_v54 = vpop.permute.xlu0 %82  ;;  %v111_v55 = vpop.permute.xlu1 %110  ;;  %2613 = vmatprep.mubr.msk.f32.mxu0 %vm3104_vm0, %v3105_v4 }
  0x99   :  { %v160_v56 = vsel %vm153_vm1, %v3242_v11, %v83_v54  ;;  %v354_v11 = vld [vmem:[%s3696_s3 + $0x8] sm:$0xf] }
  0x9a   :  { %v170_v57 = vsel %vm163_vm2, %v160_v56, %v111_v55 }
  0x9c   :  { %v139_v58 = vpop.permute.xlu0 %138  ;;  %v85_v59 = vpop.permute.xlu1 %84 }
  0x9d   :  { %v180_v60 = vsel %vm173_vm3, %v170_v57, %v139_v58  ;;  %v161_v61 = vsel %vm153_vm1, %v3255_v12, %v85_v59  ;;  %v2848_v12 = vpack.c.bf16 %v354_v11, %v353_v10  ;;  %v2417_v10 = vld [vmem:[%s3699_s5] ss:$0 sm:$0xff]  ;;  %s3108_s5 = smov 64  }
  0x9e   :  { %2614 = vmatmul.mubr.msk.f32.gmra.mrb[12].mxu0 %vm190_vm4, %v180_v60 }
  0x9f   :  { %2616 = vmatprep.mubr.msk.f32.mxu0 %vm3104_vm0, %v3105_v4  ;;  %2850 = vmatprep.subr.msk.bf16.mxu1 %vm2849_vm7, %v2848_v12 }
  0xa0   :  { %v113_v62 = vpop.permute.xlu0 %112  ;;  %v141_v63 = vpop.permute.xlu1 %140  ;;  %2853 = vmatpush3.bf16.msk.msra.mxu1 %vm2849_vm7, %v2848_v12 }
  0xa1   :  { %v171_v0 = vsel %vm163_vm2, %v161_v61, %v113_v62  ;;  %2854 = vmatprep.subr.bf16.mxu1 %v3101_v2 }
  0xa2   :  { %v181_v1 = vsel %vm173_vm3, %v171_v0, %v141_v63 }
  0xa3   :  { %2617 = vmatmul.mubr.msk.f32.gmra.mrb[14].mxu0 %vm190_vm4, %v181_v1 }
  0xa4   :  { %v87_v3 = vpop.permute.xlu0 %86  ;;  %2619 = vmatprep.mubr.msk.f32.mxu0 %vm3104_vm0, %v3105_v4  ;;  %v115_v6 = vpop.permute.xlu1 %114 }
  0xa5   :  { %v162_v5 = vsel %vm153_vm1, %v3264_v13, %v87_v3  ;;  %v355_v13 = vld [vmem:[%s3697_s4] sm:$0xff] }
  0xa6   :  { %v172_v7 = vsel %vm163_vm2, %v162_v5, %v115_v6  ;;  %v3369_v15 = vpack.c.bf16 %v356_v14, %v355_v13 }
  0xa8   :  { %v143_v8 = vpop.permute.xlu0 %142  ;;  %2874 = vmatpush3.bf16.msra.mxu0 %v3369_v15 }
  0xa9   :  { %v182_v9 = vsel %vm173_vm3, %v172_v7, %v143_v8  ;;  %2875 = vmatprep.subr.bf16.mxu0 %v3101_v2 }
  0xaa   :  { %2620 = vmatmul.mubr.msk.f32.gmra.mrb[16].mxu0 %vm190_vm4, %v182_v9 }
  0xab   :  { %2679 = vmatprep.mubr.msk.f32.mxu0 %vm3104_vm0, %v3105_v4 }
  0xac   :  { %2877 = vmatpush3.bf16.msra.mxu0 %v3379_v18 }
  0xad   :  { %2884 = vmatprep.subr.bf16.mxu0 %v3101_v2 }
 0x14e   :  { %v284_v20 = vpop.f32.mrb[0].mxu0 }
 0x14f   :  { %v2597_v21 = vpop.f32.mrb[1].mxu0  ;;  %v285_v22 = vadd.f32 %v2407_v19, %v284_v20 }
 0x151   :  { %v328_v26 = vmax.f32 %v285_v22, 0.0 }
 0x152   :  { %v289_v23 = vpop.f32.mrb[2].mxu0 }
 0x153   :  { %v290_v24 = vadd.f32 %v2407_v19, %v289_v23  ;;  %v2600_v25 = vpop.f32.mrb[3].mxu0 }
 0x155   :  { %v329_v27 = vmax.f32 %v290_v24, 0.0 }
 0x157   :  { %v337_v28 = vadd.f32 %v329_v27, %v328_v26 }
 0x159   :  { %v294_v29 = vpop.f32.mrb[4].mxu0  ;;  %v345_v30 = vmul.f32 0.5, %v337_v28 }
 0x15a   :  { %v295_v31 = vadd.f32 %v2407_v19, %v294_v29  ;;  %v2603_v32 = vpop.f32.mrb[5].mxu0 }
 0x15b   :  { %2626 = vmatprep.mubr.msk.f32.mxu1 %vm163_vm2, %v345_v30 }
 0x15c   :  { %v330_v33 = vmax.f32 %v295_v31, 0.0 }
 0x15e   :  { %v338_v34 = vadd.f32 %v330_v33, %v329_v27  ;;  %v299_v35 = vpop.f32.mrb[6].mxu0 }
 0x15f   :  { %v300_v36 = vadd.f32 %v2407_v19, %v299_v35  ;;  %v2606_v37 = vpop.f32.mrb[7].mxu0 }
 0x160   :  { %v346_v38 = vmul.f32 0.5, %v338_v34 }
 0x161   :  { %v331_v39 = vmax.f32 %v300_v36, 0.0 }
 0x162   :  { %2627 = vmatmul.mubr.msk.f32.vlgmr.msra.gmra.mrb[0].mxu1 %vm163_vm2, %v346_v38 }
 0x163   :  { %v339_v40 = vadd.f32 %v331_v39, %v330_v33  ;;  %2856 = vmatpush3.bf16.msra.mxu1 %v3369_v15 }
 0x164   :  { %2857 = vmatprep.subr.bf16.mxu1 %v3101_v2 }
 0x165   :  { %v347_v41 = vmul.f32 0.5, %v339_v40  ;;  %v304_v42 = vpop.f32.mrb[8].mxu0 }
 0x166   :  { %v305_v43 = vadd.f32 %v2407_v19, %v304_v42  ;;  %v2609_v44 = vpop.f32.mrb[9].mxu0 }
 0x167   :  { %2629 = vmatprep.mubr.msk.f32.mxu1 %vm163_vm2, %v347_v41  ;;  %2859 = vmatpush3.bf16.msra.mxu1 %v3379_v18 }
 0x168   :  { %v332_v45 = vmax.f32 %v305_v43, 0.0  ;;  %2860 = vmatprep.subr.bf16.mxu1 %v3101_v2 }
 0x16a   :  { %v340_v46 = vadd.f32 %v332_v45, %v331_v39  ;;  %v309_v47 = vpop.f32.mrb[10].mxu0 }
 0x16b   :  { %v310_v48 = vadd.f32 %v2407_v19, %v309_v47  ;;  %v2612_v49 = vpop.f32.mrb[11].mxu0 }
 0x16c   :  { %v348_v50 = vmul.f32 0.5, %v340_v46 }
 0x16d   :  { %v333_v51 = vmax.f32 %v310_v48, 0.0 }
 0x16e   :  { %2630 = vmatmul.mubr.msk.f32.gmra.mrb[2].mxu1 %vm163_vm2, %v348_v50 }
 0x16f   :  { %v341_v52 = vadd.f32 %v333_v51, %v332_v45 }
 0x171   :  { %v349_v53 = vmul.f32 0.5, %v341_v52  ;;  %v314_v54 = vpop.f32.mrb[12].mxu0 }
 0x172   :  { %v315_v55 = vadd.f32 %v2407_v19, %v314_v54  ;;  %v2615_v56 = vpop.f32.mrb[13].mxu0 }
 0x173   :  { %2632 = vmatprep.mubr.msk.f32.mxu1 %vm163_vm2, %v349_v53 }
 0x174   :  { %v334_v57 = vmax.f32 %v315_v55, 0.0 }
 0x176   :  { %v342_v58 = vadd.f32 %v334_v57, %v333_v51  ;;  %v319_v59 = vpop.f32.mrb[14].mxu0 }
 0x177   :  { %v320_v60 = vadd.f32 %v2407_v19, %v319_v59  ;;  %v2618_v61 = vpop.f32.mrb[15].mxu0 }
 0x178   :  { %v350_v62 = vmul.f32 0.5, %v342_v58 }
 0x179   :  { %v335_v63 = vmax.f32 %v320_v60, 0.0 }
 0x17a   :  { %2633 = vmatmul.mubr.msk.f32.gmra.mrb[4].mxu1 %vm163_vm2, %v350_v62 }
 0x17b   :  { %v343_v0 = vadd.f32 %v335_v63, %v334_v57 }
 0x17d   :  { %v351_v1 = vmul.f32 0.5, %v343_v0  ;;  %v324_v3 = vpop.f32.mrb[16].mxu0 }
 0x17e   :  { %v325_v5 = vadd.f32 %v2407_v19, %v324_v3  ;;  %v2621_v6 = vpop.f32.mrb[17].mxu0 }
 0x17f   :  { %2635 = vmatprep.mubr.msk.f32.mxu1 %vm163_vm2, %v351_v1 }
 0x180   :  { %v336_v7 = vmax.f32 %v325_v5, 0.0 }
 0x182   :  { %v344_v8 = vadd.f32 %v336_v7, %v335_v63 }
 0x184   :  { %v352_v9 = vmul.f32 0.5, %v344_v8 }
 0x186   :  { %2636 = vmatmul.mubr.msk.f32.gmra.mrb[6].mxu1 %vm163_vm2, %v352_v9 }
 0x187   :  { %2646 = vmatprep.mubr.msk.f32.mxu1 %vm3104_vm0, %v3105_v4 }
 0x18a   :  { %2647 = vmatmul.mubr.f32.vlgmr.msra.gmra.mrb[8].mxu1 %v3105_v4 }
 0x18b   :  { %2862 = vmatpush3.bf16.msra.mxu1 %v3369_v15  ;;  %2657 = vmatprep.mubr.msk.f32.mxu1 %vm3104_vm0, %v3105_v4 }
 0x18c   :  { %2863 = vmatprep.subr.bf16.mxu1 %v3101_v2 }
 0x18f   :  { %2865 = vmatpush3.bf16.msra.mxu1 %v3379_v18 }
 0x190   :  { %2866 = vmatprep.subr.bf16.mxu1 %v3101_v2 }
 0x235   :  { %v2628_v11 = vpop.f32.mrb[0].mxu1 }
 0x236   :  { %v466_v12 = vadd.f32 %v2628_v11, %v2417_v10  ;;  %v460_v13 = vpop.f32.mrb[1].mxu1 }
 0x237   :  { %v461_v28 = vadd.f32 %v2417_v10, %v460_v13 }
 0x241   :  { %v2631_v14 = vpop.f32.mrb[2].mxu1 }
 0x242   :  { %v3410_v16 = vadd.f32 %v2631_v14, %v2417_v10  ;;  %v470_v17 = vpop.f32.mrb[3].mxu1 }
 0x243   :  { %v3412_v19 = vadd.f32 %v2417_v10, %v470_v17 }
 0x24d   :  { %v2634_v20 = vpop.f32.mrb[4].mxu1 }
 0x24e   :  { %v3414_v21 = vadd.f32 %v2634_v20, %v2417_v10  ;;  %v480_v22 = vpop.f32.mrb[5].mxu1 }
 0x24f   :  { %v3416_v23 = vadd.f32 %v2417_v10, %v480_v22 }
 0x259   :  { %v2637_v24 = vpop.f32.mrb[6].mxu1 }
 0x25a   :  { %v3418_v25 = vadd.f32 %v2637_v24, %v2417_v10  ;;  %v490_v26 = vpop.f32.mrb[7].mxu1 }
 0x25b   :  { %v3420_v27 = vadd.f32 %v2417_v10, %v490_v26 }
 0x25d   :  { %v578_v29 = vpop.f32.mrb[8].mxu1 }
 0x25e   :  { %v579_v30 = vadd.f32 %v578_v29, %v461_v28  ;;  %v2648_v31 = vpop.f32.mrb[9].mxu1 }
 0x260   :  { %2973 = vtanh.f32 %v579_v30  ;;  %v2427_v33 = vmul.f32 -1.442695, %v579_v30 }
 0x262   :  { %2975 = vpow2.f32 %v2427_v33 }
 0x26a   :  { %v2974_v32 = vpop.eup %2973 }
 0x26b   :  { %591 = vrot.lane.b32.xlu1 %v2974_v32, %s3108_s5 }
 0x26c   :  { %v2976_v34 = vpop.eup %2975 }
 0x26d   :  { %v585_v35 = vadd.f32 1.0, %v2976_v34 }
 0x26f   :  { %2977 = vrcp.f32 %v585_v35 }
 0x279   :  { %v2978_v36 = vpop.eup %2977 }
 0x27a   :  { %v589_v39 = vmul.f32 0.0, %v2978_v36 }
 0x2dd   :  { %v592_v37 = vpop.permute.xlu1 %591 }
 0x2de   :  { %v594_v38 = vmul.f32 %v2978_v36, %v592_v37 }
 0x2e0   :  { %596 = vrot.lane.b32.xlu0 %v594_v38, %s3109_s19 }
 0x352   :  { %v597_v40 = vpop.permute.xlu0 %596 }
 0x353   :  { %v599_v41 = vadd.f32 %v597_v40, %v589_v39 }
 0x355   :  { %2979 = vtanh.f32 %v599_v41 }
 0x35f   :  { %v2980_v42 = vpop.eup %2979 }
 0x360   :  { %602 = vrot.lane.b32.xlu1 %v2980_v42, %s3108_s5 }
 0x3d2   :  { %v603_v43 = vpop.permute.xlu1 %602 }
 0x3d3   :  { %v605_v44 = vmul.f32 %v2978_v36, %v603_v43 }
 0x3d5   :  { %607 = vrot.lane.b32.xlu0 %v605_v44, %s3109_s19 }
 0x447   :  { %v608_v45 = vpop.permute.xlu0 %607 }
 0x448   :  { %610 = vst.msk [vmem:[#allocation3] sm:$0xff] %vm508_vm8, %v608_v45  ;;  %2658 = vmatmul.mubr.msk.f32.vlgmr.msra.gmra.mrb[10].mxu1 %vm508_vm8, %v608_v45 }
 0x449   :  { %2868 = vmatpush3.bf16.msra.mxu1 %v3369_v15  ;;  %2668 = vmatprep.mubr.msk.f32.mxu1 %vm3104_vm0, %v3105_v4 }
 0x44a   :  { %2869 = vmatprep.subr.bf16.mxu1 %v3101_v2 }
 0x44d   :  { %2871 = vmatpush3.bf16.msra.mxu1 %v3379_v18 }
 0x44e   :  { %2878 = vmatprep.subr.bf16.mxu1 %v3101_v2 }
 0x51b   :  { %v681_v46 = vpop.f32.mrb[10].mxu1 }
 0x51c   :  { %v682_v47 = vadd.f32 %v681_v46, %v466_v12  ;;  %v2659_v48 = vpop.f32.mrb[11].mxu1 }
 0x51e   :  { %2981 = vtanh.f32 %v682_v47  ;;  %v2429_v50 = vmul.f32 -1.442695, %v682_v47 }
 0x520   :  { %2983 = vpow2.f32 %v2429_v50 }
 0x528   :  { %v2982_v49 = vpop.eup %2981 }
 0x529   :  { %694 = vrot.lane.b32.xlu1 %v2982_v49, %s3108_s5 }
 0x52a   :  { %v2984_v51 = vpop.eup %2983 }
 0x52b   :  { %v688_v52 = vadd.f32 1.0, %v2984_v51 }
 0x52d   :  { %2985 = vrcp.f32 %v688_v52 }
 0x537   :  { %v2986_v53 = vpop.eup %2985 }
 0x538   :  { %v692_v56 = vmul.f32 %v2986_v53, %v599_v41 }
 0x59b   :  { %v695_v54 = vpop.permute.xlu1 %694 }
 0x59c   :  { %v697_v55 = vmul.f32 %v2986_v53, %v695_v54 }
 0x59e   :  { %699 = vrot.lane.b32.xlu0 %v697_v55, %s3109_s19 }
 0x610   :  { %v700_v57 = vpop.permute.xlu0 %699 }
 0x611   :  { %v702_v58 = vadd.f32 %v700_v57, %v692_v56 }
 0x613   :  { %2987 = vtanh.f32 %v702_v58 }
 0x61d   :  { %v2988_v59 = vpop.eup %2987 }
 0x61e   :  { %705 = vrot.lane.b32.xlu1 %v2988_v59, %s3108_s5 }
 0x690   :  { %v706_v60 = vpop.permute.xlu1 %705 }
 0x691   :  { %v708_v61 = vmul.f32 %v2986_v53, %v706_v60 }
 0x693   :  { %710 = vrot.lane.b32.xlu0 %v708_v61, %s3109_s19 }
 0x705   :  { %v711_v62 = vpop.permute.xlu0 %710 }
 0x706   :  { %714 = vst.msk [vmem:[#allocation3 + $0x8] sm:$0xff] %vm508_vm8, %v711_v62  ;;  %2669 = vmatmul.mubr.msk.f32.vlgmr.msra.gmra.mrb[12].mxu1 %vm508_vm8, %v711_v62 }
 0x707   :  { %2880 = vmatpush3.bf16.msra.mxu1 %v3369_v15  ;;  %2690 = vmatprep.mubr.msk.f32.mxu1 %vm3104_vm0, %v3105_v4 }
 0x708   :  { %2881 = vmatprep.subr.bf16.mxu1 %v3101_v2 }
 0x70b   :  { %2883 = vmatpush3.bf16.msra.mxu1 %v3379_v18 }
 0x70c   :  { %2890 = vmatprep.subr.bf16.mxu1 %v3101_v2 }
 0x7d9   :  { %v785_v63 = vpop.f32.mrb[12].mxu1 }
 0x7da   :  { %v786_v0 = vadd.f32 %v785_v63, %v3412_v19  ;;  %v2670_v1 = vpop.f32.mrb[13].mxu1 }
 0x7dc   :  { %2989 = vtanh.f32 %v786_v0  ;;  %v2431_v5 = vmul.f32 -1.442695, %v786_v0 }
 0x7de   :  { %2991 = vpow2.f32 %v2431_v5 }
 0x7e6   :  { %v2990_v3 = vpop.eup %2989 }
 0x7e7   :  { %798 = vrot.lane.b32.xlu1 %v2990_v3, %s3108_s5 }
 0x7e8   :  { %v2992_v6 = vpop.eup %2991 }
 0x7e9   :  { %v792_v7 = vadd.f32 1.0, %v2992_v6  ;;  %v1340_v6 = vld [vmem:[%s3700_s6 + $0x8] sm:$0xff] }
 0x7eb   :  { %2993 = vrcp.f32 %v792_v7 }
 0x7f5   :  { %v2994_v8 = vpop.eup %2993 }
 0x7f6   :  { %v796_v11 = vmul.f32 %v2994_v8, %v702_v58 }
 0x859   :  { %v799_v9 = vpop.permute.xlu1 %798 }
 0x85a   :  { %v801_v10 = vmul.f32 %v2994_v8, %v799_v9 }
 0x85c   :  { %803 = vrot.lane.b32.xlu0 %v801_v10, %s3109_s19 }
 0x8ce   :  { %v804_v12 = vpop.permute.xlu0 %803 }
 0x8cf   :  { %v806_v13 = vadd.f32 %v804_v12, %v796_v11  ;;  %v1341_v11 = vld [vmem:[%s3700_s6 + $0x10] sm:$0xff]  ;;  %v1342_v12 = vld [vmem:[%s3700_s6 + $0x18] sm:$0xff] }
 0x8d1   :  { %2995 = vtanh.f32 %v806_v13 }
 0x8db   :  { %v2996_v14 = vpop.eup %2995 }
 0x8dc   :  { %809 = vrot.lane.b32.xlu1 %v2996_v14, %s3108_s5 }
 0x94e   :  { %v810_v17 = vpop.permute.xlu1 %809 }
 0x94f   :  { %v812_v19 = vmul.f32 %v2994_v8, %v810_v17  ;;  %v1348_v17 = vld [vmem:[#allocation3] sm:$0xff] }
 0x951   :  { %814 = vrot.lane.b32.xlu0 %v812_v19, %s3109_s19  ;;  %v1349_v19 = vld [vmem:[#allocation3 + $0x8] sm:$0xff] }
 0x9c3   :  { %v815_v20 = vpop.permute.xlu0 %814 }
 0x9c4   :  { %818 = vst.msk [vmem:[#allocation3 + $0x10] sm:$0xff] %vm508_vm8, %v815_v20  ;;  %2680 = vmatmul.mubr.msk.f32.vlgmr.msra.gmra.mrb[18].mxu0 %vm508_vm8, %v815_v20 }
 0x9c5   :  { %2886 = vmatpush3.bf16.msra.mxu0 %v3369_v15  ;;  %2701 = vmatprep.mubr.msk.f32.mxu0 %vm3104_vm0, %v3105_v4 }
 0x9c6   :  { %2887 = vmatprep.subr.bf16.mxu0 %v3101_v2 }
 0x9c9   :  { %2889 = vmatpush3.bf16.msra.mxu0 %v3379_v18 }
 0x9ca   :  { %2896 = vmatprep.subr.bf16.mxu0 %v3101_v2 }
 0x9cb   :  { %v1350_v20 = vld [vmem:[#allocation3 + $0x10] sm:$0xff] }
 0xa97   :  { %v889_v22 = vpop.f32.mrb[18].mxu0 }
 0xa98   :  { %v890_v24 = vadd.f32 %v889_v22, %v3410_v16  ;;  %v2681_v26 = vpop.f32.mrb[19].mxu0 }
 0xa9a   :  { %2997 = vtanh.f32 %v890_v24  ;;  %v2433_v29 = vmul.f32 -1.442695, %v890_v24 }
 0xa9c   :  { %2999 = vpow2.f32 %v2433_v29 }
 0xaa4   :  { %v2998_v28 = vpop.eup %2997 }
 0xaa5   :  { %902 = vrot.lane.b32.xlu1 %v2998_v28, %s3108_s5 }
 0xaa6   :  { %v3000_v30 = vpop.eup %2999 }
 0xaa7   :  { %v896_v31 = vadd.f32 1.0, %v3000_v30 }
 0xaa9   :  { %3001 = vrcp.f32 %v896_v31 }
 0xab3   :  { %v3002_v32 = vpop.eup %3001 }
 0xab4   :  { %v900_v35 = vmul.f32 %v3002_v32, %v806_v13  ;;  %v2906_v13 = vpack.c.bf16 %v1342_v12, %v1341_v11 }
 0xb17   :  { %v903_v33 = vpop.permute.xlu1 %902 }
 0xb18   :  { %v905_v34 = vmul.f32 %v3002_v32, %v903_v33 }
 0xb1a   :  { %907 = vrot.lane.b32.xlu0 %v905_v34, %s3109_s19 }
 0xb8c   :  { %v908_v36 = vpop.permute.xlu0 %907 }
 0xb8d   :  { %v910_v37 = vadd.f32 %v908_v36, %v900_v35 }
 0xb8f   :  { %3003 = vtanh.f32 %v910_v37 }
 0xb99   :  { %v3004_v16 = vpop.eup %3003 }
 0xb9a   :  { %913 = vrot.lane.b32.xlu1 %v3004_v16, %s3108_s5 }
 0xc0c   :  { %v914_v38 = vpop.permute.xlu1 %913 }
 0xc0d   :  { %v916_v39 = vmul.f32 %v3002_v32, %v914_v38 }
 0xc0f   :  { %918 = vrot.lane.b32.xlu0 %v916_v39, %s3109_s19 }
 0xc81   :  { %v919_v40 = vpop.permute.xlu0 %918 }
 0xc82   :  { %922 = vst.msk [vmem:[#allocation3 + $0x18] sm:$0xff] %vm508_vm8, %v919_v40  ;;  %2691 = vmatmul.mubr.msk.f32.vlgmr.msra.gmra.mrb[14].mxu1 %vm508_vm8, %v919_v40 }
 0xc83   :  { %2892 = vmatpush3.bf16.msra.mxu1 %v3369_v15  ;;  %2712 = vmatprep.mubr.msk.f32.mxu1 %vm3104_vm0, %v3105_v4 }
 0xc84   :  { %2893 = vmatprep.subr.bf16.mxu1 %v3101_v2 }
 0xc87   :  { %2895 = vmatpush3.bf16.msra.mxu1 %v3379_v18 }
 0xc89   :  { %v1351_v22 = vld [vmem:[#allocation3 + $0x18] sm:$0xff] }
 0xd55   :  { %v993_v41 = vpop.f32.mrb[14].mxu1 }
 0xd56   :  { %v994_v42 = vadd.f32 %v993_v41, %v3416_v23  ;;  %v2692_v43 = vpop.f32.mrb[15].mxu1 }
 0xd58   :  { %3005 = vtanh.f32 %v994_v42  ;;  %v2435_v45 = vmul.f32 -1.442695, %v994_v42 }
 0xd5a   :  { %3007 = vpow2.f32 %v2435_v45 }
 0xd62   :  { %v3006_v44 = vpop.eup %3005 }
 0xd63   :  { %1006 = vrot.lane.b32.xlu1 %v3006_v44, %s3108_s5 }
 0xd64   :  { %v3008_v46 = vpop.eup %3007 }
 0xd65   :  { %v1000_v47 = vadd.f32 1.0, %v3008_v46  ;;  %v1343_v46 = vld [vmem:[%s3701_s7] sm:$0xff] }
 0xd67   :  { %3009 = vrcp.f32 %v1000_v47  ;;  %v1344_v47 = vld [vmem:[%s3701_s7 + $0x8] sm:$0xff] }
 0xd71   :  { %v3010_v48 = vpop.eup %3009 }
 0xd72   :  { %v1004_v51 = vmul.f32 %v3010_v48, %v910_v37 }
 0xdd5   :  { %v1007_v49 = vpop.permute.xlu1 %1006 }
 0xdd6   :  { %v1009_v50 = vmul.f32 %v3010_v48, %v1007_v49  ;;  %v1345_v49 = vld [vmem:[%s3701_s7 + $0x10] sm:$0xff] }
 0xdd8   :  { %1011 = vrot.lane.b32.xlu0 %v1009_v50, %s3109_s19  ;;  %v1346_v50 = vld [vmem:[%s3701_s7 + $0x18] sm:$0xff] }
 0xe4a   :  { %v1012_v52 = vpop.permute.xlu0 %1011 }
 0xe4b   :  { %v1014_v53 = vadd.f32 %v1012_v52, %v1004_v51  ;;  %v3543_v51 = vpack.c.bf16 %v1346_v50, %v1345_v49 }
 0xe4d   :  { %3011 = vtanh.f32 %v1014_v53 }
 0xe57   :  { %v3012_v23 = vpop.eup %3011 }
 0xe58   :  { %1017 = vrot.lane.b32.xlu1 %v3012_v23, %s3108_s5 }
 0xeca   :  { %v1018_v54 = vpop.permute.xlu1 %1017 }
 0xecb   :  { %v1020_v55 = vmul.f32 %v3010_v48, %v1018_v54  ;;  %v3533_v48 = vpack.c.bf16 %v1344_v47, %v1343_v46 }
 0xecd   :  { %1022 = vrot.lane.b32.xlu0 %v1020_v55, %s3109_s19 }
 0xf3f   :  { %v1023_v56 = vpop.permute.xlu0 %1022 }
 0xf40   :  { %1026 = vst.msk [vmem:[#allocation3 + $0x20] sm:$0xff] %vm508_vm8, %v1023_v56  ;;  %2702 = vmatmul.mubr.msk.f32.vlgmr.msra.gmra.mrb[20].mxu0 %vm508_vm8, %v1023_v56 }
 0xf41   :  { %2898 = vmatpush3.bf16.msra.mxu0 %v3369_v15  ;;  %2723 = vmatprep.mubr.msk.f32.mxu0 %vm3104_vm0, %v3105_v4 }
 0xf42   :  { %2899 = vmatprep.subr.bf16.mxu0 %v3101_v2 }
 0xf45   :  { %2901 = vmatpush3.bf16.msra.mxu0 %v3379_v18 }
 0xf46   :  { %2910 = vmatprep.subr.bf16.mxu0 %v3101_v2 }
 0xf47   :  { %v1352_v24 = vld [vmem:[#allocation3 + $0x20] sm:$0xff] }
0x1013   :  { %v1097_v57 = vpop.f32.mrb[20].mxu0 }
0x1014   :  { %v1098_v58 = vadd.f32 %v1097_v57, %v3414_v21  ;;  %v2703_v59 = vpop.f32.mrb[21].mxu0  ;;  %v1339_v21 = vld [vmem:[%s3700_s6] sm:$0xff] }
0x1015   :  { %v2902_v7 = vpack.c.bf16 %v1340_v6, %v1339_v21 }
0x1016   :  { %3013 = vtanh.f32 %v1098_v58  ;;  %v2437_v61 = vmul.f32 -1.442695, %v1098_v58  ;;  %v3568_v58 = vld [vmem:[%s3702_s8] ss:$0 sm:$0xff] }
0x1017   :  { %2903 = vmatprep.subr.bf16.mxu1 %v2902_v7 }
0x1018   :  { %3015 = vpow2.f32 %v2437_v61 }
0x1020   :  { %v3014_v60 = vpop.eup %3013 }
0x1021   :  { %1110 = vrot.lane.b32.xlu1 %v3014_v60, %s3108_s5 }
0x1022   :  { %v3016_v15 = vpop.eup %3015 }
0x1023   :  { %v1104_v62 = vadd.f32 1.0, %v3016_v15 }
0x1025   :  { %3017 = vrcp.f32 %v1104_v62 }
0x102f   :  { %v3018_v63 = vpop.eup %3017 }
0x1030   :  { %v1108_v18 = vmul.f32 %v3018_v63, %v1014_v53 }
0x1093   :  { %v1111_v0 = vpop.permute.xlu1 %1110 }
0x1094   :  { %v1113_v1 = vmul.f32 %v3018_v63, %v1111_v0 }
0x1096   :  { %1115 = vrot.lane.b32.xlu0 %v1113_v1, %s3109_s19 }
0x1108   :  { %v1116_v3 = vpop.permute.xlu0 %1115 }
0x1109   :  { %v1118_v5 = vadd.f32 %v1116_v3, %v1108_v18 }
0x110b   :  { %3019 = vtanh.f32 %v1118_v5 }
0x1115   :  { %v3020_v8 = vpop.eup %3019 }
0x1116   :  { %1121 = vrot.lane.b32.xlu1 %v3020_v8, %s3108_s5 }
0x1188   :  { %v1122_v9 = vpop.permute.xlu1 %1121 }
0x1189   :  { %v1124_v10 = vmul.f32 %v3018_v63, %v1122_v9 }
0x118b   :  { %1126 = vrot.lane.b32.xlu0 %v1124_v10, %s3109_s19 }
0x11fd   :  { %v1127_v14 = vpop.permute.xlu0 %1126 }
0x11fe   :  { %1130 = vst.msk [vmem:[#allocation3 + $0x28] sm:$0xff] %vm508_vm8, %v1127_v14  ;;  %2713 = vmatmul.mubr.msk.f32.vlgmr.msra.gmra.mrb[16].mxu1 %vm508_vm8, %v1127_v14 }
0x11ff   :  { %2905 = vmatpush3.bf16.msra.mxu1 %v2902_v7  ;;  %2734 = vmatprep.mubr.msk.f32.mxu1 %vm508_vm8, %v1348_v17 }
0x1200   :  { %2907 = vmatprep.subr.bf16.mxu1 %v2906_v13 }
0x1203   :  { %2909 = vmatpush3.bf16.msra.mxu1 %v2906_v13 }
0x1204   :  { %2922 = vmatprep.subr.bf16.mxu1 %v3101_v2 }
0x1205   :  { %v1353_v26 = vld [vmem:[#allocation3 + $0x28] sm:$0xff] }
0x1206   :  { %2735 = vmatmul.mubr.msk.f32.vlgmr.msra.gmra.mrb[18].mxu1 %vm508_vm8, %v1349_v19 }
0x1207   :  { %2737 = vmatprep.mubr.msk.f32.mxu1 %vm508_vm8, %v1350_v20  ;;  %2924 = vmatpush3.bf16.msra.mxu1 %v3533_v48 }
0x1208   :  { %2925 = vmatprep.subr.bf16.mxu1 %v3101_v2 }
0x120a   :  { %2738 = vmatmul.mubr.msk.f32.gmra.mrb[20].mxu1 %vm508_vm8, %v1351_v22 }
0x120b   :  { %2740 = vmatprep.mubr.msk.f32.mxu1 %vm508_vm8, %v1352_v24  ;;  %2927 = vmatpush3.bf16.msra.mxu1 %v3543_v51 }
0x120c   :  { %2934 = vmatprep.subr.bf16.mxu1 %v3101_v2 }
0x120e   :  { %2741 = vmatmul.mubr.msk.f32.gmra.mrb[22].mxu1 %vm508_vm8, %v1353_v26 }
0x12d1   :  { %v1201_v28 = vpop.f32.mrb[16].mxu1 }
0x12d2   :  { %v1202_v29 = vadd.f32 %v1201_v28, %v3420_v27  ;;  %v2714_v30 = vpop.f32.mrb[17].mxu1 }
0x12d4   :  { %3021 = vtanh.f32 %v1202_v29  ;;  %v2439_v16 = vmul.f32 -1.442695, %v1202_v29 }
0x12d6   :  { %3023 = vpow2.f32 %v2439_v16 }
0x12d9   :  { %v3511_v31 = vpop.f32.mrb[18].mxu1 }
0x12da   :  { %v1452_v32 = vpop.f32.mrb[19].mxu1 }
0x12db   :  { %v1453_v59 = vadd.f32 %v3568_v58, %v1452_v32  ;;  %v1458_v32 = vadd.f32 %v3511_v31, %v3568_v58 }
0x12dd   :  { %v3513_v33 = vpop.f32.mrb[20].mxu1 }
0x12de   :  { %v3022_v34 = vpop.eup %3021  ;;  %v3515_v35 = vpop.f32.mrb[21].mxu1 }
0x12df   :  { %1214 = vrot.lane.b32.xlu1 %v3022_v34, %s3108_s5 }
0x12e0   :  { %v3024_v38 = vpop.eup %3023 }
0x12e1   :  { %v3518_v36 = vpop.f32.mrb[22].mxu1  ;;  %v1208_v27 = vadd.f32 1.0, %v3024_v38 }
0x12e2   :  { %v3520_v37 = vpop.f32.mrb[23].mxu1 }
0x12e3   :  { %3025 = vrcp.f32 %v1208_v27 }
0x12ed   :  { %v3026_v39 = vpop.eup %3025 }
0x12ee   :  { %v1212_v42 = vmul.f32 %v3026_v39, %v1118_v5 }
0x1351   :  { %v1215_v40 = vpop.permute.xlu1 %1214 }
0x1352   :  { %v1217_v41 = vmul.f32 %v3026_v39, %v1215_v40 }
0x1354   :  { %1219 = vrot.lane.b32.xlu0 %v1217_v41, %s3109_s19 }
0x13c6   :  { %v1220_v43 = vpop.permute.xlu0 %1219 }
0x13c7   :  { %v3523_v44 = vadd.f32 %v1220_v43, %v1212_v42 }
0x13c9   :  { %3027 = vtanh.f32 %v3523_v44 }
0x13d3   :  { %v3028_v45 = vpop.eup %3027 }
0x13d4   :  { %1225 = vrot.lane.b32.xlu1 %v3028_v45, %s3108_s5 }
0x1446   :  { %v1226_v52 = vpop.permute.xlu1 %1225 }
0x1447   :  { %v1228_v53 = vmul.f32 %v3026_v39, %v1226_v52 }
0x1449   :  { %1230 = vrot.lane.b32.xlu0 %v1228_v53, %s3109_s19 }
0x14bb   :  { %v1231_v23 = vpop.permute.xlu0 %1230 }
0x14bc   :  { %1234 = vst.msk [vmem:[#allocation3 + $0x30] sm:$0xff] %vm508_vm8, %v1231_v23  ;;  %2724 = vmatmul.mubr.msk.f32.vlgmr.msra.gmra.mrb[22].mxu0 %vm508_vm8, %v1231_v23 }
0x14bd   :  { %2912 = vmatpush3.bf16.msra.mxu0 %v3533_v48  ;;  %2754 = vmatprep.mubr.msk.f32.mxu0 %vm3104_vm0, %v3105_v4 }
0x14be   :  { %2913 = vmatprep.subr.bf16.mxu0 %v3101_v2 }
0x14c1   :  { %2915 = vmatpush3.bf16.msra.mxu0 %v3543_v51 }
0x14c2   :  { %2916 = vmatprep.subr.bf16.mxu0 %v3101_v2 }
0x14c3   :  { %v1354_v54 = vld [vmem:[#allocation3 + $0x30] sm:$0xff] }
0x14c4   :  { %2755 = vmatmul.mubr.f32.vlgmr.msra.gmra.mrb[24].mxu0 %v3105_v4  ;;  %2743 = vmatprep.mubr.msk.f32.mxu1 %vm508_vm8, %v1354_v54 }
0x14c5   :  { %2918 = vmatpush3.bf16.msra.mxu0 %v3533_v48  ;;  %2765 = vmatprep.mubr.msk.f32.mxu0 %vm3104_vm0, %v3105_v4 }
0x14c6   :  { %2919 = vmatprep.subr.bf16.mxu0 %v3101_v2 }
0x14c9   :  { %2921 = vmatpush3.bf16.msra.mxu0 %v3543_v51 }
0x14ca   :  { %2928 = vmatprep.subr.bf16.mxu0 %v3101_v2 }
0x158f   :  { %v1305_v55 = vpop.f32.mrb[22].mxu0 }
0x1590   :  { %v1306_v56 = vadd.f32 %v1305_v55, %v3418_v25  ;;  %v2725_v57 = vpop.f32.mrb[23].mxu0 }
0x1592   :  { %v2441_v9 = vmul.f32 -1.442695, %v1306_v56 }
0x1597   :  { %v1566_v60 = vpop.f32.mrb[24].mxu0 }
0x1598   :  { %v1567_v61 = vadd.f32 %v1566_v60, %v1453_v59  ;;  %v2756_v15 = vpop.f32.mrb[25].mxu0 }
0x159a   :  { %3029 = vtanh.f32 %v1567_v61  ;;  %v2451_v63 = vmul.f32 -1.442695, %v1567_v61 }
0x159c   :  { %3031 = vpow2.f32 %v2451_v63 }
0x15a4   :  { %v3030_v62 = vpop.eup %3029 }
0x15a5   :  { %1579 = vrot.lane.b32.xlu1 %v3030_v62, %s3108_s5 }
0x15a6   :  { %v3032_v0 = vpop.eup %3031 }
0x15a7   :  { %v1573_v1 = vadd.f32 1.0, %v3032_v0 }
0x15a9   :  { %3033 = vrcp.f32 %v1573_v1 }
0x15b3   :  { %v3034_v25 = vpop.eup %3033 }
0x15b4   :  { %v1577_v5 = vmul.f32 0.0, %v3034_v25 }
0x1617   :  { %v1580_v18 = vpop.permute.xlu1 %1579 }
0x1618   :  { %v1582_v3 = vmul.f32 %v3034_v25, %v1580_v18 }
0x161a   :  { %1584 = vrot.lane.b32.xlu0 %v1582_v3, %s3109_s19 }
0x168c   :  { %v1585_v21 = vpop.permute.xlu0 %1584 }
0x168d   :  { %v1587_v6 = vadd.f32 %v1585_v21, %v1577_v5 }
0x168f   :  { %3035 = vtanh.f32 %v1587_v6 }
0x1690   :  { %3037 = vtanh.f32 %v1306_v56  ;;  %v1463_v56 = vadd.f32 %v3568_v58, %v3515_v35 }
0x1691   :  { %3039 = vpow2.f32 %v2441_v9 }
0x1699   :  { %v3036_v7 = vpop.eup %3035 }
0x169a   :  { %1590 = vrot.lane.b32.xlu1 %v3036_v7, %s3108_s5  ;;  %v3038_v8 = vpop.eup %3037 }
0x169b   :  { %v3040_v10 = vpop.eup %3039 }
0x169c   :  { %v1312_v11 = vadd.f32 1.0, %v3040_v10 }
0x169e   :  { %1318 = vrot.lane.b32.xlu1 %v3038_v8, %s3108_s5  ;;  %3041 = vrcp.f32 %v1312_v11  ;;  %v1468_v8 = vadd.f32 %v3513_v33, %v3568_v58 }
0x16a8   :  { %v3042_v14 = vpop.eup %3041 }
0x16a9   :  { %v1316_v22 = vmul.f32 %v3042_v14, %v3523_v44 }
0x170c   :  { %v1591_v12 = vpop.permute.xlu1 %1590 }
0x170d   :  { %v1593_v13 = vmul.f32 %v3034_v25, %v1591_v12 }
0x170f   :  { %1596 = vrot.lane.b32.xlu0 %v1593_v13, %s3109_s19 }
0x1710   :  { %v1319_v17 = vpop.permute.xlu1 %1318 }
0x1711   :  { %v1321_v19 = vmul.f32 %v3042_v14, %v1319_v17 }
0x1713   :  { %1323 = vrot.lane.b32.xlu1 %v1321_v19, %s3109_s19 }
0x1781   :  { %v1597_v20 = vpop.permute.xlu0 %1596 }
0x1782   :  { %2766 = vmatmul.mubr.msk.f32.vlgmr.msra.gmra.mrb[26].mxu0 %vm508_vm8, %v1597_v20 }
0x1783   :  { %2930 = vmatpush3.bf16.msra.mxu0 %v3533_v48  ;;  %2787 = vmatprep.mubr.msk.f32.mxu0 %vm3104_vm0, %v3105_v4 }
0x1784   :  { %2931 = vmatprep.subr.bf16.mxu0 %v3101_v2 }
0x1785   :  { %v1324_v24 = vpop.permute.xlu1 %1323 }
0x1786   :  { %v1326_v26 = vadd.f32 %v1324_v24, %v1316_v22 }
0x1787   :  { %2933 = vmatpush3.bf16.msra.mxu0 %v3543_v51 }
0x1788   :  { %3043 = vtanh.f32 %v1326_v26  ;;  %2940 = vmatprep.subr.bf16.mxu0 %v3101_v2 }
0x1792   :  { %v3044_v28 = vpop.eup %3043 }
0x1793   :  { %1329 = vrot.lane.b32.xlu1 %v3044_v28, %s3108_s5 }
0x1805   :  { %v1330_v29 = vpop.permute.xlu1 %1329 }
0x1806   :  { %v1332_v30 = vmul.f32 %v3042_v14, %v1330_v29 }
0x1808   :  { %1334 = vrot.lane.b32.xlu1 %v1332_v30, %s3109_s19 }
0x1855   :  { %v1666_v34 = vpop.f32.mrb[26].mxu0 }
0x1856   :  { %v1667_v16 = vadd.f32 %v1666_v34, %v1458_v32  ;;  %v2767_v38 = vpop.f32.mrb[27].mxu0  ;;  %v1473_v34 = vadd.f32 %v3568_v58, %v3520_v37 }
0x1858   :  { %3045 = vtanh.f32 %v1667_v16  ;;  %v2453_v41 = vmul.f32 -1.442695, %v1667_v16 }
0x185a   :  { %3047 = vpow2.f32 %v2453_v41 }
0x1862   :  { %v3046_v27 = vpop.eup %3045 }
0x1863   :  { %1679 = vrot.lane.b32.xlu0 %v3046_v27, %s3108_s5 }
0x1864   :  { %v3048_v42 = vpop.eup %3047 }
0x1865   :  { %v1673_v31 = vadd.f32 1.0, %v3048_v42 }
0x1867   :  { %3049 = vrcp.f32 %v1673_v31 }
0x1871   :  { %v3050_v43 = vpop.eup %3049 }
0x1872   :  { %v1677_v46 = vmul.f32 %v3050_v43, %v1587_v6 }
0x187a   :  { %v1335_v39 = vpop.permute.xlu1 %1334 }
0x187b   :  { %1338 = vst.msk [vmem:[#allocation3 + $0x38] sm:$0xff] %vm508_vm8, %v1335_v39 }
0x1882   :  { %v1355_v40 = vld [vmem:[#allocation3 + $0x38] sm:$0xff] }
0x1883   :  { %2744 = vmatmul.mubr.msk.f32.gmra.mrb[24].mxu1 %vm508_vm8, %v1355_v40 }
0x1884   :  { %2776 = vmatprep.mubr.msk.f32.mxu1 %vm3104_vm0, %v3105_v4 }
0x18d5   :  { %v1680_v44 = vpop.permute.xlu0 %1679 }
0x18d6   :  { %v1682_v45 = vmul.f32 %v3050_v43, %v1680_v44 }
0x18d8   :  { %1684 = vrot.lane.b32.xlu0 %v1682_v45, %s3109_s19 }
0x194a   :  { %v1685_v47 = vpop.permute.xlu0 %1684 }
0x194b   :  { %v1687_v49 = vadd.f32 %v1685_v47, %v1677_v46 }
0x194d   :  { %3051 = vtanh.f32 %v1687_v49 }
0x1956   :  { %v3595_v50 = vpop.f32.mrb[24].mxu1 }
0x1957   :  { %v3052_v52 = vpop.eup %3051  ;;  %v3597_v53 = vpop.f32.mrb[25].mxu1 }
0x1958   :  { %1690 = vrot.lane.b32.xlu0 %v3052_v52, %s3108_s5 }
0x19ca   :  { %v1691_v23 = vpop.permute.xlu0 %1690 }
0x19cb   :  { %v1693_v54 = vmul.f32 %v3050_v43, %v1691_v23 }
0x19cd   :  { %1696 = vrot.lane.b32.xlu0 %v1693_v54, %s3109_s19  ;;  %v1478_v54 = vadd.f32 %v3518_v36, %v3568_v58 }
0x1a3f   :  { %v1697_v55 = vpop.permute.xlu0 %1696 }
0x1a40   :  { %2777 = vmatmul.mubr.msk.f32.vlgmr.msra.gmra.mrb[26].mxu1 %vm508_vm8, %v1697_v55 }
0x1a41   :  { %2936 = vmatpush3.bf16.msra.mxu1 %v3533_v48  ;;  %2798 = vmatprep.mubr.msk.f32.mxu1 %vm3104_vm0, %v3105_v4 }
0x1a42   :  { %2937 = vmatprep.subr.bf16.mxu1 %v3101_v2 }
0x1a45   :  { %2939 = vmatpush3.bf16.msra.mxu1 %v3543_v51 }
0x1a46   :  { %2946 = vmatprep.subr.bf16.mxu1 %v3101_v2 }
0x1b13   :  { %v1766_v57 = vpop.f32.mrb[26].mxu1 }
0x1b14   :  { %v1767_v59 = vadd.f32 %v1766_v57, %v1463_v56  ;;  %v2778_v60 = vpop.f32.mrb[27].mxu1 }
0x1b16   :  { %3053 = vtanh.f32 %v1767_v59  ;;  %v2455_v15 = vmul.f32 -1.442695, %v1767_v59 }
0x1b18   :  { %3055 = vpow2.f32 %v2455_v15 }
0x1b20   :  { %v3054_v61 = vpop.eup %3053 }
0x1b21   :  { %1779 = vrot.lane.b32.xlu1 %v3054_v61, %s3108_s5 }
0x1b22   :  { %v3056_v62 = vpop.eup %3055 }
0x1b23   :  { %v1773_v63 = vadd.f32 1.0, %v3056_v62 }
0x1b25   :  { %3057 = vrcp.f32 %v1773_v63 }
0x1b2f   :  { %v3058_v0 = vpop.eup %3057 }
0x1b30   :  { %v1777_v18 = vmul.f32 %v3058_v0, %v1687_v49 }
0x1b93   :  { %v1780_v1 = vpop.permute.xlu1 %1779 }
0x1b94   :  { %v1782_v25 = vmul.f32 %v3058_v0, %v1780_v1 }
0x1b96   :  { %1784 = vrot.lane.b32.xlu0 %v1782_v25, %s3109_s19 }
0x1c08   :  { %v1785_v3 = vpop.permute.xlu0 %1784 }
0x1c09   :  { %v1787_v35 = vadd.f32 %v1785_v3, %v1777_v18 }
0x1c0b   :  { %3059 = vtanh.f32 %v1787_v35 }
0x1c15   :  { %v3060_v5 = vpop.eup %3059 }
0x1c16   :  { %1790 = vrot.lane.b32.xlu1 %v3060_v5, %s3108_s5 }
0x1c88   :  { %v1791_v21 = vpop.permute.xlu1 %1790 }
0x1c89   :  { %v1793_v6 = vmul.f32 %v3058_v0, %v1791_v21 }
0x1c8b   :  { %1796 = vrot.lane.b32.xlu0 %v1793_v6, %s3109_s19 }
0x1cfd   :  { %v1797_v7 = vpop.permute.xlu0 %1796 }
0x1cfe   :  { %2788 = vmatmul.mubr.msk.f32.vlgmr.msra.gmra.mrb[28].mxu0 %vm508_vm8, %v1797_v7 }
0x1cff   :  { %2942 = vmatpush3.bf16.msra.mxu0 %v3533_v48  ;;  %2809 = vmatprep.mubr.msk.f32.mxu0 %vm3104_vm0, %v3105_v4 }
0x1d00   :  { %2943 = vmatprep.subr.bf16.mxu0 %v3101_v2 }
0x1d03   :  { %2945 = vmatpush3.bf16.msra.mxu0 %v3543_v51 }
0x1d04   :  { %2952 = vmatprep.subr.bf16.mxu0 %v3101_v2 }
0x1dd1   :  { %v1866_v9 = vpop.f32.mrb[28].mxu0 }
0x1dd2   :  { %v1867_v10 = vadd.f32 %v1866_v9, %v1468_v8  ;;  %v2789_v11 = vpop.f32.mrb[29].mxu0 }
0x1dd4   :  { %3061 = vtanh.f32 %v1867_v10  ;;  %v2457_v13 = vmul.f32 -1.442695, %v1867_v10 }
0x1dd6   :  { %3063 = vpow2.f32 %v2457_v13 }
0x1dde   :  { %v3062_v12 = vpop.eup %3061 }
0x1ddf   :  { %1879 = vrot.lane.b32.xlu1 %v3062_v12, %s3108_s5 }
0x1de0   :  { %v3064_v14 = vpop.eup %3063 }
0x1de1   :  { %v1873_v17 = vadd.f32 1.0, %v3064_v14 }
0x1de3   :  { %3065 = vrcp.f32 %v1873_v17 }
0x1ded   :  { %v3066_v19 = vpop.eup %3065 }
0x1dee   :  { %v1877_v24 = vmul.f32 %v3066_v19, %v1787_v35  ;;  %v1483_v35 = vadd.f32 %v3568_v58, %v3597_v53 }
0x1e51   :  { %v1880_v20 = vpop.permute.xlu1 %1879 }
0x1e52   :  { %v1882_v22 = vmul.f32 %v3066_v19, %v1880_v20 }
0x1e54   :  { %1884 = vrot.lane.b32.xlu0 %v1882_v22, %s3109_s19 }
0x1ec6   :  { %v1885_v26 = vpop.permute.xlu0 %1884 }
0x1ec7   :  { %v1887_v33 = vadd.f32 %v1885_v26, %v1877_v24  ;;  %v1488_v24 = vadd.f32 %v3595_v50, %v3568_v58  ;;  %v2294_v50 = vld [vmem:[%s3703_s9] sm:$0xff] }
0x1ec9   :  { %3067 = vtanh.f32 %v1887_v33 }
0x1ed3   :  { %v3068_v28 = vpop.eup %3067 }
0x1ed4   :  { %1890 = vrot.lane.b32.xlu1 %v3068_v28, %s3108_s5 }
0x1f46   :  { %v1891_v29 = vpop.permute.xlu1 %1890 }
0x1f47   :  { %v1893_v30 = vmul.f32 %v3066_v19, %v1891_v29 }
0x1f49   :  { %1896 = vrot.lane.b32.xlu0 %v1893_v30, %s3109_s19 }
0x1fbb   :  { %v1897_v32 = vpop.permute.xlu0 %1896 }
0x1fbc   :  { %2799 = vmatmul.mubr.msk.f32.vlgmr.msra.gmra.mrb[28].mxu1 %vm508_vm8, %v1897_v32 }
0x1fbd   :  { %2948 = vmatpush3.bf16.msra.mxu1 %v3533_v48  ;;  %2820 = vmatprep.mubr.msk.f32.mxu1 %vm3104_vm0, %v3105_v4 }
0x1fbe   :  { %2949 = vmatprep.subr.bf16.mxu1 %v3101_v2 }
0x1fc1   :  { %2951 = vmatpush3.bf16.msra.mxu1 %v3543_v51 }
0x1fc2   :  { %2958 = vmatprep.subr.bf16.mxu1 %v3101_v2 }
0x208f   :  { %v1966_v16 = vpop.f32.mrb[28].mxu1 }
0x2090   :  { %v1967_v38 = vadd.f32 %v1966_v16, %v1473_v34  ;;  %v2800_v27 = vpop.f32.mrb[29].mxu1 }
0x2092   :  { %3069 = vtanh.f32 %v1967_v38  ;;  %v2459_v40 = vmul.f32 -1.442695, %v1967_v38 }
0x2094   :  { %3071 = vpow2.f32 %v2459_v40 }
0x209c   :  { %v3070_v39 = vpop.eup %3069 }
0x209d   :  { %1979 = vrot.lane.b32.xlu1 %v3070_v39, %s3108_s5 }
0x209e   :  { %v3072_v41 = vpop.eup %3071 }
0x209f   :  { %v1973_v42 = vadd.f32 1.0, %v3072_v41  ;;  %v2295_v41 = vld [vmem:[%s3703_s9 + $0x8] sm:$0xff] }
0x20a1   :  { %3073 = vrcp.f32 %v1973_v42  ;;  %v2296_v42 = vld [vmem:[%s3703_s9 + $0x10] sm:$0xff] }
0x20ab   :  { %v3074_v31 = vpop.eup %3073 }
0x20ac   :  { %v1977_v45 = vmul.f32 %v3074_v31, %v1887_v33 }
0x210f   :  { %v1980_v43 = vpop.permute.xlu1 %1979 }
0x2110   :  { %v1982_v44 = vmul.f32 %v3074_v31, %v1980_v43  ;;  %v2297_v43 = vld [vmem:[%s3703_s9 + $0x18] sm:$0xff] }
0x2112   :  { %1984 = vrot.lane.b32.xlu0 %v1982_v44, %s3109_s19  ;;  %v2962_v44 = vpack.c.bf16 %v2297_v43, %v2296_v42 }
0x2184   :  { %v1985_v46 = vpop.permute.xlu0 %1984 }
0x2185   :  { %v1987_v37 = vadd.f32 %v1985_v46, %v1977_v45 }
0x2187   :  { %3075 = vtanh.f32 %v1987_v37 }
0x2191   :  { %v3076_v47 = vpop.eup %3075 }
0x2192   :  { %1990 = vrot.lane.b32.xlu1 %v3076_v47, %s3108_s5 }
0x2204   :  { %v1991_v49 = vpop.permute.xlu1 %1990 }
0x2205   :  { %v1993_v52 = vmul.f32 %v3074_v31, %v1991_v49  ;;  %v2959_v31 = vpack.c.bf16 %v2295_v41, %v2294_v50  ;;  %v18_v49 = vstv %s3704_s12 }
0x2206   :  { %19 = vst [vmem:[#allocation4] sm:$0x1] %v18_v49 }
0x2207   :  { %1996 = vrot.lane.b32.xlu0 %v1993_v52, %s3109_s19 }
0x2279   :  { %v1997_v23 = vpop.permute.xlu0 %1996 }
0x227a   :  { %2810 = vmatmul.mubr.msk.f32.vlgmr.msra.gmra.mrb[30].mxu0 %vm508_vm8, %v1997_v23 }
0x227b   :  { %2954 = vmatpush3.bf16.msra.mxu0 %v3533_v48  ;;  %2831 = vmatprep.mubr.msk.f32.mxu0 %vm3104_vm0, %v3105_v4 }
0x227c   :  { %2955 = vmatprep.subr.bf16.mxu0 %v3101_v2 }
0x227f   :  { %2957 = vmatpush3.bf16.msra.mxu0 %v3543_v51 }
0x234d   :  { %v2066_v55 = vpop.f32.mrb[30].mxu0 }
0x234e   :  { %v2067_v56 = vadd.f32 %v2066_v55, %v1478_v54  ;;  %v2811_v57 = vpop.f32.mrb[31].mxu0  ;;  %v2468_v55 = vld [vmem:[%s3706_s11] ss:$0 sm:$0xff] }
0x2350   :  { %3077 = vtanh.f32 %v2067_v56  ;;  %v2461_v60 = vmul.f32 -1.442695, %v2067_v56 }
0x2352   :  { %3079 = vpow2.f32 %v2461_v60  ;;  %v2469_v60 = vld [vmem:[#allocation4] ss:$0 sm:$0xff] }
0x235a   :  { %v3078_v59 = vpop.eup %3077 }
0x235b   :  { %2079 = vrot.lane.b32.xlu1 %v3078_v59, %s3108_s5 }
0x235c   :  { %v3080_v48 = vpop.eup %3079 }
0x235d   :  { %v2073_v61 = vadd.f32 1.0, %v3080_v48 }
0x235f   :  { %3081 = vrcp.f32 %v2073_v61 }
0x2369   :  { %v3082_v15 = vpop.eup %3081 }
0x236a   :  { %v2077_v51 = vmul.f32 %v3082_v15, %v1987_v37 }
0x23cd   :  { %v2080_v62 = vpop.permute.xlu1 %2079 }
0x23ce   :  { %v2082_v63 = vmul.f32 %v3082_v15, %v2080_v62 }
0x23d0   :  { %2084 = vrot.lane.b32.xlu0 %v2082_v63, %s3109_s19 }
0x2442   :  { %v2085_v0 = vpop.permute.xlu0 %2084 }
0x2443   :  { %v2087_v36 = vadd.f32 %v2085_v0, %v2077_v51 }
0x2445   :  { %3083 = vtanh.f32 %v2087_v36 }
0x244f   :  { %v3084_v1 = vpop.eup %3083 }
0x2450   :  { %2090 = vrot.lane.b32.xlu1 %v3084_v1, %s3108_s5 }
0x24c2   :  { %v2091_v25 = vpop.permute.xlu1 %2090 }
0x24c3   :  { %v2093_v18 = vmul.f32 %v3082_v15, %v2091_v25 }
0x24c5   :  { %2096 = vrot.lane.b32.xlu0 %v2093_v18, %s3109_s19 }
0x2537   :  { %v2097_v3 = vpop.permute.xlu0 %2096 }
0x2538   :  { %2821 = vmatmul.mubr.msk.f32.vlgmr.msra.gmra.mrb[30].mxu1 %vm508_vm8, %v2097_v3 }
0x2539   :  { %2842 = vmatprep.mubr.msk.f32.mxu1 %vm3104_vm0, %v3105_v4  ;;  %2960 = vmatpush3.bf16.msra.mxu1 %v2959_v31 }
0x253a   :  { %2961 = vmatprep.subr.bf16.mxu1 %v3101_v2  ;;  %v2466_v2 = vld [vmem:[%s3705_s10] ss:$0 sm:$0xff] }
0x253d   :  { %2963 = vmatpush3.bf16.msra.mxu1 %v2962_v44 }
0x260b   :  { %v2166_v5 = vpop.f32.mrb[30].mxu1 }
0x260c   :  { %v2167_v21 = vadd.f32 %v2166_v5, %v1483_v35  ;;  %v2822_v6 = vpop.f32.mrb[31].mxu1 }
0x260e   :  { %3085 = vtanh.f32 %v2167_v21  ;;  %v2463_v8 = vmul.f32 -1.442695, %v2167_v21 }
0x2610   :  { %3087 = vpow2.f32 %v2463_v8 }
0x2618   :  { %v3086_v7 = vpop.eup %3085 }
0x2619   :  { %2179 = vrot.lane.b32.xlu1 %v3086_v7, %s3108_s5 }
0x261a   :  { %v3088_v9 = vpop.eup %3087 }
0x261b   :  { %v2173_v10 = vadd.f32 1.0, %v3088_v9 }
0x261d   :  { %3089 = vrcp.f32 %v2173_v10 }
0x2627   :  { %v3090_v11 = vpop.eup %3089 }
0x2628   :  { %v2177_v4 = vmul.f32 %v3090_v11, %v2087_v36 }
0x268b   :  { %v2180_v12 = vpop.permute.xlu1 %2179 }
0x268c   :  { %v2182_v13 = vmul.f32 %v3090_v11, %v2180_v12 }
0x268e   :  { %2184 = vrot.lane.b32.xlu0 %v2182_v13, %s3109_s19 }
0x2700   :  { %v2185_v14 = vpop.permute.xlu0 %2184 }
0x2701   :  { %v2187_v53 = vadd.f32 %v2185_v14, %v2177_v4 }
0x2703   :  { %3091 = vtanh.f32 %v2187_v53 }
0x270d   :  { %v3092_v17 = vpop.eup %3091 }
0x270e   :  { %2190 = vrot.lane.b32.xlu1 %v3092_v17, %s3108_s5 }
0x2780   :  { %v2191_v19 = vpop.permute.xlu1 %2190 }
0x2781   :  { %v2193_v20 = vmul.f32 %v3090_v11, %v2191_v19 }
0x2783   :  { %2196 = vrot.lane.b32.xlu0 %v2193_v20, %s3109_s19 }
0x27f5   :  { %v2197_v22 = vpop.permute.xlu0 %2196 }
0x27f6   :  { %2832 = vmatmul.mubr.msk.f32.vlgmr.msra.gmra.mrb[32].mxu0 %vm508_vm8, %v2197_v22 }
0x28c9   :  { %v2266_v26 = vpop.f32.mrb[32].mxu0 }
0x28ca   :  { %v2267_v33 = vadd.f32 %v2266_v26, %v1488_v24  ;;  %v2833_v28 = vpop.f32.mrb[33].mxu0 }
0x28cc   :  { %3093 = vtanh.f32 %v2267_v33  ;;  %v2465_v30 = vmul.f32 -1.442695, %v2267_v33 }
0x28ce   :  { %3095 = vpow2.f32 %v2465_v30 }
0x28d6   :  { %v3094_v29 = vpop.eup %3093 }
0x28d7   :  { %2279 = vrot.lane.b32.xlu1 %v3094_v29, %s3108_s5 }
0x28d8   :  { %v3096_v32 = vpop.eup %3095 }
0x28d9   :  { %v2273_v34 = vadd.f32 1.0, %v3096_v32 }
0x28db   :  { %3097 = vrcp.f32 %v2273_v34 }
0x28e5   :  { %v3098_v16 = vpop.eup %3097 }
0x28e6   :  { %v2277_v39 = vmul.f32 %v3098_v16, %v2187_v53 }
0x2949   :  { %v2280_v38 = vpop.permute.xlu1 %2279 }
0x294a   :  { %v2282_v27 = vmul.f32 %v3098_v16, %v2280_v38 }
0x294c   :  { %2284 = vrot.lane.b32.xlu0 %v2282_v27, %s3109_s19 }
0x29be   :  { %v2285_v40 = vpop.permute.xlu0 %2284 }
0x29bf   :  { %v2287_v58 = vadd.f32 %v2285_v40, %v2277_v39 }
0x29c1   :  { %3099 = vtanh.f32 %v2287_v58 }
0x29cb   :  { %v3100_v45 = vpop.eup %3099 }
0x29cc   :  { %2290 = vrot.lane.b32.xlu1 %v3100_v45, %s3108_s5 }
0x2a3e   :  { %v2291_v46 = vpop.permute.xlu1 %2290 }
0x2a3f   :  { %v2293_v37 = vmul.f32 %v3098_v16, %v2291_v46 }
0x2a41   :  { %2306 = vrot.lane.b32.xlu0 %v2293_v37, %s3109_s19 }
0x2ab3   :  { %v2307_v47 = vpop.permute.xlu0 %2306 }
0x2ab4   :  { %2843 = vmatmul.mubr.msk.f32.vlgmr.msra.gmra.mrb[32].mxu1 %vm508_vm8, %v2307_v47 }
0x2b87   :  { %v2376_v52 = vpop.f32.mrb[32].mxu1 }
0x2b88   :  { %v2377_v23 = vadd.f32 %v2466_v2, %v2376_v52  ;;  %v2844_v54 = vpop.f32.mrb[33].mxu1 }
0x2b8a   :  { %v2380_v56 = vmax.f32 %v2377_v23, 0.0 }
0x2b8c   :  { %v2388_v57 = vmul.f32 %v2468_v55, %v2380_v56 }
0x2b8e   :  { %v2390_v59 = vsel %vm2389_vm9, %v2388_v57, 0.0 }
0x2b8f   :  { %2391 = vadd.xlane.f32.xlu1 %v2390_v59 }
0x2c1c   :  { %v2392_v48 = vpop.xlane.xlu1 %2391 }
0x2c1d   :  { %v2400_v61 = vadd.f32 %v2469_v60, %v2392_v48 }
0x2c1f   :  { %2402 = vst.msk [vmem:[%s3707_s13] sm:$0xff] %vm2401_vm10, %v2400_v61 }

</bundles_post_ra>
